<compile_context>
chip_gen: v7x
topology: tpu7x:2x2x1
jax: 0.10.0
libtpu: 0.0.40
codegen_flags: <defaults>
</compile_context>

<pallas_src>
import functools

import jax
import jax.numpy as jnp
import numpy as np
from jax import lax
from jax.experimental import pallas as pl
from jax.experimental.pallas import tpu as pltpu


def _round_up(x, m):
    return ((x + m - 1) // m) * m


def _cdiv(a, b):
    return -(-a // b)


def _rvq_kernel(z_ref, w_in_ref, cb_ref, cb_sq_ref, wout_ref,
                zq_ref, idx_ref, stats_ref,
                *, emb_num, vq_num, total_rows, fuse_out, unroll):
    t = z_ref.shape[0]
    cdt = w_in_ref.dtype                                     # MXU operand dtype (f32 or bf16)

    z = z_ref[...].astype(jnp.float32)                       # (T, in_ch) f32 working copy
    # hoisted iota, reused by argmin + one-hot gather in every layer
    iota_lane = lax.broadcasted_iota(jnp.int32, (t, emb_num), 1)

    def layer(i, carry):
        z_q, idx_sum, closs, scale = carry
        r = (z - z_q).astype(cdt)                             # residual (cast only for matmul)
        w_in = w_in_ref[i]                                    # (in_ch, emb_ch)
        cb = cb_ref[i]                                        # (emb_num, emb_ch)
        cb_sq = cb_sq_ref[i]                                  # (1, emb_num), precomputed
        wout = wout_ref[i]                                    # fused: (emb_num, in_ch) = cb@w_out
                                                              # else : (emb_ch,  in_ch) = w_out

        # linear_in
        z_e = jnp.dot(r, w_in, preferred_element_type=jnp.float32)          # (T, emb_ch) f32

        # argmin ||z_e - cb||^2: the per-row ||z_e||^2 term is constant along the
        # codebook axis -> dropped from the argmin operand.  Contract on the last
        # axis of both operands so the MXU consumes cb directly (no transpose).
        cross = lax.dot_general(z_e.astype(cdt), cb,
                                dimension_numbers=(((1,), (1,)), ((), ())),
                                preferred_element_type=jnp.float32)          # (T, emb_num)
        dist = cb_sq - 2.0 * cross

        # argmin with first-minimum tie-break (matches torch.argmin)
        min_d = jnp.min(dist, axis=-1, keepdims=True)
        idx = jnp.min(jnp.where(dist == min_d, iota_lane, emb_num),
                      axis=-1, keepdims=True)                 # (T, 1) int32

        # sum((z_q_i - z_e)^2) == min_d + ||z_e||^2  (z_q_i never materialized here)
        closs = closs + min_d + jnp.sum(z_e * z_e, axis=-1, keepdims=True)

        # codebook lookup via one-hot matmul (TPU-friendly gather)
        onehot = (iota_lane == idx).astype(cdt)
        if fuse_out:
            # linear_out fused into the gather: r_q = onehot @ (cb @ w_out)
            r_q = jnp.dot(onehot, wout, preferred_element_type=jnp.float32)   # (T, in_ch)
        else:
            z_q_i = jnp.dot(onehot, cb, preferred_element_type=jnp.float32)   # (T, emb_ch)
            r_q = jnp.dot(z_q_i.astype(cdt), wout, preferred_element_type=jnp.float32)

        z_q = z_q + r_q
        idx_sum = idx_sum + idx * scale
        return z_q, idx_sum, closs, scale * emb_num

    carry = (jnp.zeros_like(z),                               # running quantized reconstruction
             jnp.zeros((t, 1), jnp.int32),                    # index_sum
             jnp.zeros((t, 1), jnp.float32),                  # per-row codebook-loss accumulator
             jnp.int32(1))                                    # running cumprod of emb_num
    if unroll:
        for i in range(vq_num):                               # static unroll (small vq_num)
            carry = layer(i, carry)
    else:
        carry = lax.fori_loop(0, vq_num, layer, carry)        # bounded live ranges (large vq_num)
    z_q, idx_sum, closs, _ = carry

    zq_ref[...] = z_q.astype(zq_ref.dtype)
    idx_ref[...] = idx_sum

    # Mask padded rows out of the loss partial sums and emit one lane-dense
    # (1, 1, 128) per-tile stats slab: lane 0 = sum (z_q_i - z_e)^2, lane 1 = sum (z_q - z)^2.
    row = pl.program_id(0) * t + lax.broadcasted_iota(jnp.int32, (t, 1), 0)
    valid = (row < total_rows).astype(jnp.float32)
    closs_total = jnp.sum(closs * valid)
    rloss_total = jnp.sum(jnp.sum((z_q - z) ** 2, axis=-1, keepdims=True) * valid)
    lane = lax.broadcasted_iota(jnp.int32, (1, 1, 128), 2)
    stats_ref[...] = jnp.where(lane == 0, closs_total,
                               jnp.where(lane == 1, rloss_total, 0.0))


def residual_vq(z, w_in, codebooks, w_out, *, commitment_weight=1.0,
                tile_rows=None, compute_dtype=jnp.float32, out_dtype=None,
                fuse_linear_out=None, unroll_layers=None):
    """Residual VQ forward pass.

    z: (B, N, in_ch); w_in: (L, in_ch, emb_ch); codebooks: (L, emb_num, emb_ch);
    w_out: (L, emb_ch, in_ch).  Pass w_in=None / w_out=None for the in_ch == emb_ch
    nn.Identity case.  Returns (z_q, index_sum, loss).

    tile_rows: rows per grid step (None -> auto-sized from the VMEM budget).
    compute_dtype: dtype fed to the MXU (jnp.float32 or jnp.bfloat16); bf16 is the
        recommended setting on v5e.  Distances / losses / accumulation stay f32.
    out_dtype: dtype of the z_q output (default: z.dtype).
    """
    B, N, in_ch = z.shape
    vq_num, emb_num, emb_ch = codebooks.shape
    rows = B * N

    if w_in is None:                                          # nn.Identity case
        assert in_ch == emb_ch
        w_in = jnp.broadcast_to(jnp.eye(in_ch, dtype=jnp.float32), (vq_num, in_ch, emb_ch))
    if w_out is None:
        assert in_ch == emb_ch
        w_out = jnp.broadcast_to(jnp.eye(emb_ch, dtype=jnp.float32), (vq_num, emb_ch, in_ch))

    cdt = jnp.dtype(compute_dtype)
    odt = jnp.dtype(out_dtype) if out_dtype is not None else jnp.dtype(z.dtype)
    cdt_size = cdt.itemsize
    out_size = odt.itemsize

    if fuse_linear_out is None:
        fuse_linear_out = in_ch <= emb_ch                     # net MXU-FLOP win in this regime
    if unroll_layers is None:
        unroll_layers = vq_num <= 4

    # ---- weight prep (loop-invariant across the grid -> hoisted here) --------
    w_in_c = w_in.astype(cdt)
    cb_c = codebooks.astype(cdt)
    cb_sq = jnp.sum(cb_c.astype(jnp.float32) ** 2, axis=-1)[:, None, :]   # (L, 1, emb_num) f32
    if fuse_linear_out:
        wout_c = jnp.einsum('lke,lec->lkc', codebooks.astype(jnp.float32),
                            w_out.astype(jnp.float32),
                            precision=jax.lax.Precision.HIGHEST).astype(cdt)  # (L, emb_num, in_ch)
    else:
        wout_c = w_out.astype(cdt)                                            # (L, emb_ch, in_ch)

    weight_bytes = (int(w_in_c.size + cb_c.size + wout_c.size) * cdt_size
                    + int(cb_sq.size) * 4)
    # TODO(synk): for weights that exceed the VMEM budget (very large L*emb_num*emb_ch),
    # move the layer loop onto a trailing "arbitrary" grid axis with per-layer blocks.

    # ---- VMEM budget: ~80% of this generation's capacity ---------------------
    try:
        vmem_cap = int(pltpu.get_tpu_info().vmem_capacity_bytes)
    except Exception:
        vmem_cap = 64 * 1024 * 1024                            # safe floor (v7x-sized)
    vmem_limit = max(32 * 1024 * 1024, min(int(vmem_cap * 0.8), 112 * 1024 * 1024))

    # ---- row tiling: biggest tile that fits the budget ------------------------
    if tile_rows is None:
        per_row = (2 * cdt_size * in_ch                       # double-buffered z input tile
                   + 2 * out_size * in_ch                     # double-buffered z_q output tile
                   + 4 * (2 * in_ch + 2 * emb_ch)             # z, z_q, z_e f32 working copies
                   + cdt_size * (in_ch + emb_ch + emb_num)    # r, z_e cast, onehot
                   + 4 * 3 * emb_num                          # cross/dist, iota, headroom
                   + 64)
        avail = max(vmem_limit - weight_bytes, vmem_limit // 4)
        tr = max(8, min(1024, int(avail * 0.7) // per_row))
        tr = (tr // 8) * 8
        tr = min(tr, _round_up(rows, 8))
        nt = _cdiv(rows, tr)
        if nt > 1 and nt % 2 == 1:                            # keep both v7x TCs busy
            tr = min(tr, _round_up(_cdiv(rows, nt + 1), 8))
    else:
        tr = _round_up(max(8, int(tile_rows)), 8)
        tr = min(tr, _round_up(rows, 8))
    rows_p = _round_up(rows, tr)
    num_tiles = rows_p // tr

    z2 = z.reshape(rows, in_ch).astype(cdt)
    if rows_p != rows:
        z2 = jnp.pad(z2, ((0, rows_p - rows), (0, 0)))

    kernel = functools.partial(_rvq_kernel, emb_num=emb_num, vq_num=vq_num,
                               total_rows=rows, fuse_out=bool(fuse_linear_out),
                               unroll=bool(unroll_layers))
    # TODO(synk): index_sum is int32; for emb_num**vq_num > 2**31 return per-layer
    # indices instead (equivalent to rq_index_sum=False, which is not implemented).

    # Advisory cost estimate so XLA schedules the wrapper-side glue sensibly.
    per_row_flops = in_ch * emb_ch + emb_ch * emb_num
    per_row_flops += emb_num * in_ch if fuse_linear_out else (emb_num * emb_ch + emb_ch * in_ch)
    cost = pl.CostEstimate(
        flops=int(2 * vq_num * rows_p * per_row_flops),
        transcendentals=0,
        bytes_accessed=int(rows_p * in_ch * cdt_size + weight_bytes
                           + rows_p * in_ch * out_size + rows_p * 4 + num_tiles * 512))

    out_shape = (jax.ShapeDtypeStruct((rows_p, in_ch), odt),
                 jax.ShapeDtypeStruct((rows_p, 1), jnp.int32),
                 jax.ShapeDtypeStruct((num_tiles, 1, 128), jnp.float32))

    def run(weight_mode):
        def wspec(shape):
            if weight_mode is None:
                return pl.BlockSpec(shape, lambda i: (0,) * len(shape))
            return pl.BlockSpec(shape, lambda i: (0,) * len(shape),
                                pipeline_mode=weight_mode)

        grid_spec = pltpu.PrefetchScalarGridSpec(
            num_scalar_prefetch=0,
            grid=(num_tiles,),
            in_specs=[pl.BlockSpec((tr, in_ch), lambda i: (i, 0)),
                      wspec(w_in_c.shape),
                      wspec(cb_c.shape),
                      wspec(cb_sq.shape),
                      wspec(wout_c.shape)],
            out_specs=[pl.BlockSpec((tr, in_ch), lambda i: (i, 0)),
                       pl.BlockSpec((tr, 1), lambda i: (i, 0)),
                       pl.BlockSpec((1, 1, 128), lambda i: (i, 0, 0))])
        return pl.pallas_call(
            kernel,
            out_shape=out_shape,
            grid_spec=grid_spec,
            cost_estimate=cost,
            compiler_params=pltpu.CompilerParams(
                dimension_semantics=("parallel",),            # shards row tiles across v7x TCs
                vmem_limit_bytes=int(vmem_limit)),
        )(z2, w_in_c, cb_c, cb_sq, wout_c)

    outs = None
    if hasattr(pl, "Buffered"):
        try:
            # Weights have a constant index_map -> single-buffer them (halves weight VMEM).
            outs = run(pl.Buffered(1))
        except Exception:                                      # pipeline_mode unsupported here
            outs = None
    if outs is None:
        outs = run(None)
    zq2, idx2, stats = outs

    z_q = zq2[:rows].reshape(B, N, in_ch)
    index = idx2[:rows, 0].reshape(B, N)

    # loss = mean_i[(cw+1)*mean((z_q_i - z_e_i)^2)] + mean((z_q - z)^2)
    closs_sum = jnp.sum(stats[:, 0, 0])
    rloss_sum = jnp.sum(stats[:, 0, 1])
    loss = ((commitment_weight + 1.0) * closs_sum / (rows * emb_ch) / vq_num
            + rloss_sum / (rows * in_ch))
    return z_q, index, loss


def residual_vq_ref(z, w_in, codebooks, w_out, *, commitment_weight=1.0):
    """Pure-JAX reference reproducing the PyTorch forward values."""
    B, N, in_ch = z.shape
    vq_num, emb_num, emb_ch = codebooks.shape
    z_q = jnp.zeros_like(z)
    loss = 0.0
    idx_sum = jnp.zeros((B, N), jnp.int32)
    cum = 1
    for i in range(vq_num):
        r = z - z_q
        z_e = jnp.einsum('bnc,ce->bne', r, w_in[i])
        cb = codebooks[i]
        dist = (jnp.sum(z_e ** 2, -1, keepdims=True) + jnp.sum(cb ** 2, -1)
                - 2.0 * jnp.einsum('bne,se->bns', z_e, cb))
        idx = jnp.argmin(dist, axis=-1)
        z_q_i = cb[idx]
        loss = loss + (commitment_weight + 1.0) * jnp.mean((z_q_i - z_e) ** 2)
        r_q = jnp.einsum('bne,ec->bnc', z_q_i, w_out[i])
        z_q = z_q + r_q
        idx_sum = idx_sum + idx.astype(jnp.int32) * cum
        cum *= emb_num
    loss = loss / vq_num + jnp.mean((z_q - z) ** 2)
    return z_q, idx_sum, loss


def _make_inputs(B, N, in_ch, vq_num, emb_num, emb_ch, key):
    k1, k2, k3, k4 = jax.random.split(key, 4)
    w_in = 0.1 * jax.random.normal(k1, (vq_num, in_ch, emb_ch), jnp.float32)
    codebooks = jax.random.normal(k2, (vq_num, emb_num, emb_ch), jnp.float32)
    w_out = 0.1 * jax.random.normal(k3, (vq_num, emb_ch, in_ch), jnp.float32)
    z = jax.random.normal(k4, (B, N, in_ch), jnp.float32)
    return z, w_in, codebooks, w_out


if __name__ == "__main__":
    # Case 1: module-consistent small shapes; single tile, fused linear_out, unrolled layers.
    z, w_in, cbs, w_out = _make_inputs(2, 8, 8, 3, 16, 32, jax.random.PRNGKey(0))
    z_q, index, loss = residual_vq(z, w_in, cbs, w_out, commitment_weight=1.0)
    jax.block_until_ready((z_q, index, loss))
    z_q_r, index_r, loss_r = residual_vq_ref(z, w_in, cbs, w_out, commitment_weight=1.0)
    np.testing.assert_array_equal(np.asarray(index), np.asarray(index_r))
    np.testing.assert_allclose(np.asarray(z_q), np.asarray(z_q_r), rtol=1e-3, atol=1e-3)
    np.testing.assert_allclose(float(loss), float(loss_r), rtol=1e-3, atol=1e-3)

    # Case 2: rows not a multiple of the tile -> exercises padding/masking + multi-tile grid.
    z, w_in, cbs, w_out = _make_inputs(2, 36, 16, 3, 16, 24, jax.random.PRNGKey(1))
    z_q, index, loss = residual_vq(z, w_in, cbs, w_out, commitment_weight=0.25, tile_rows=32)
    jax.block_until_ready((z_q, index, loss))
    z_q_r, index_r, loss_r = residual_vq_ref(z, w_in, cbs, w_out, commitment_weight=0.25)
    np.testing.assert_array_equal(np.asarray(index), np.asarray(index_r))
    np.testing.assert_allclose(np.asarray(z_q), np.asarray(z_q_r), rtol=1e-3, atol=1e-3)
    np.testing.assert_allclose(float(loss), float(loss_r), rtol=1e-3, atol=1e-3)

    # Case 3: bf16 operand path (recommended on v5e) - exercise + sanity only, since
    # argmin ties can resolve differently from the f32 reference.
    z_q_b, index_b, loss_b = residual_vq(z, w_in, cbs, w_out, commitment_weight=0.25,
                                         tile_rows=32, compute_dtype=jnp.bfloat16)
    jax.block_until_ready((z_q_b, index_b, loss_b))
    assert bool(jnp.all(jnp.isfinite(z_q_b))) and bool(jnp.isfinite(loss_b))

    # Case 4: in_ch > emb_ch (unfused linear_out) and vq_num > 4 (fori_loop layer loop).
    z, w_in, cbs, w_out = _make_inputs(2, 20, 48, 6, 12, 32, jax.random.PRNGKey(2))
    z_q, index, loss = residual_vq(z, w_in, cbs, w_out, commitment_weight=0.5)
    jax.block_until_ready((z_q, index, loss))
    z_q_r, index_r, loss_r = residual_vq_ref(z, w_in, cbs, w_out, commitment_weight=0.5)
    np.testing.assert_array_equal(np.asarray(index), np.asarray(index_r))
    np.testing.assert_allclose(np.asarray(z_q), np.asarray(z_q_r), rtol=1e-3, atol=1e-3)
    np.testing.assert_allclose(float(loss), float(loss_r), rtol=1e-3, atol=1e-3)

    print("KERNEL_OK")
</pallas_src>

<mosaic_0001>
module attributes {stable_mosaic.version = 11 : i64} {
  func.func @_rvq_kernel(%arg0: i32, %arg1: memref<16x8xf32, #tpu.memory_space<vmem>>, %arg2: memref<3x8x32xf32, #tpu.memory_space<vmem>>, %arg3: memref<3x16x32xf32, #tpu.memory_space<vmem>>, %arg4: memref<3x1x16xf32, #tpu.memory_space<vmem>>, %arg5: memref<3x16x8xf32, #tpu.memory_space<vmem>>, %arg6: memref<16x8xf32, #tpu.memory_space<vmem>>, %arg7: memref<16x1xi32, #tpu.memory_space<vmem>>, %arg8: memref<1x1x128xf32, #tpu.memory_space<vmem>>) attributes {dimension_semantics = [#tpu.dimension_semantics<parallel>], iteration_bounds = array<i64: 1>, scalar_prefetch = 0 : i64, scratch_operands = 0 : i64, tpu.core_type = #tpu.core_type<tc>, window_params = [{transform_indices = @transform_0, window_bounds = array<i64: 16, 8>}, {pipeline_mode = #tpu.pipeline_mode<synchronous>, transform_indices = @transform_1, window_bounds = array<i64: 3, 8, 32>}, {pipeline_mode = #tpu.pipeline_mode<synchronous>, transform_indices = @transform_2, window_bounds = array<i64: 3, 16, 32>}, {pipeline_mode = #tpu.pipeline_mode<synchronous>, transform_indices = @transform_3, window_bounds = array<i64: 3, 1, 16>}, {pipeline_mode = #tpu.pipeline_mode<synchronous>, transform_indices = @transform_4, window_bounds = array<i64: 3, 16, 8>}, {transform_indices = @transform_5, window_bounds = array<i64: 16, 8>}, {transform_indices = @transform_6, window_bounds = array<i64: 16, 1>}, {transform_indices = @transform_7, window_bounds = array<i64: 1, 1, 128>}]} {
    %c0 = arith.constant 0 : index
    %c0_0 = arith.constant 0 : index
    %0 = vector.load %arg1[%c0, %c0_0] : memref<16x8xf32, #tpu.memory_space<vmem>>, vector<16x8xf32>
    %1 = tpu.iota {dimensions = array<i32: 1>} : vector<16x16xi32>
    %cst = arith.constant 0.000000e+00 : f32
    %2 = vector.broadcast %cst : f32 to vector<16x8xf32>
    %c0_i32 = arith.constant 0 : i32
    %3 = vector.broadcast %c0_i32 : i32 to vector<16x1xi32>
    %cst_1 = arith.constant 0.000000e+00 : f32
    %4 = vector.broadcast %cst_1 : f32 to vector<16x1xf32>
    %5 = arith.subf %0, %2 : vector<16x8xf32>
    %c0_2 = arith.constant 0 : index
    %c0_3 = arith.constant 0 : index
    %c0_4 = arith.constant 0 : index
    %6 = vector.load %arg2[%c0_2, %c0_3, %c0_4] : memref<3x8x32xf32, #tpu.memory_space<vmem>>, vector<1x8x32xf32>
    %7 = vector.shape_cast %6 : vector<1x8x32xf32> to vector<8x32xf32>
    %c0_5 = arith.constant 0 : index
    %c0_6 = arith.constant 0 : index
    %c0_7 = arith.constant 0 : index
    %8 = vector.load %arg3[%c0_5, %c0_6, %c0_7] : memref<3x16x32xf32, #tpu.memory_space<vmem>>, vector<1x16x32xf32>
    %9 = vector.shape_cast %8 : vector<1x16x32xf32> to vector<16x32xf32>
    %c0_8 = arith.constant 0 : index
    %c0_9 = arith.constant 0 : index
    %c0_10 = arith.constant 0 : index
    %10 = vector.load %arg4[%c0_8, %c0_9, %c0_10] : memref<3x1x16xf32, #tpu.memory_space<vmem>>, vector<1x1x16xf32>
    %11 = vector.shape_cast %10 : vector<1x1x16xf32> to vector<1x16xf32>
    %c0_11 = arith.constant 0 : index
    %c0_12 = arith.constant 0 : index
    %c0_13 = arith.constant 0 : index
    %12 = vector.load %arg5[%c0_11, %c0_12, %c0_13] : memref<3x16x8xf32, #tpu.memory_space<vmem>>, vector<1x16x8xf32>
    %13 = vector.shape_cast %12 : vector<1x16x8xf32> to vector<16x8xf32>
    %cst_14 = arith.constant dense<0.000000e+00> : vector<16x32xf32>
    %14 = tpu.matmul %5, %7, %cst_14 {dimension_numbers = #tpu.dot_dimension_numbers<[1], [0], [0], [1], [0, 0, 1, 1], [], []>} : vector<16x8xf32>, vector<8x32xf32>, vector<16x32xf32> -> vector<16x32xf32>
    %cst_15 = arith.constant dense<0.000000e+00> : vector<16x16xf32>
    %15 = tpu.matmul %14, %9, %cst_15 {dimension_numbers = #tpu.dot_dimension_numbers<[1], [1], [0], [0], [0, 0, 1, 0], [], []>} : vector<16x32xf32>, vector<16x32xf32>, vector<16x16xf32> -> vector<16x16xf32>
    %cst_16 = arith.constant 2.000000e+00 : f32
    %16 = vector.broadcast %cst_16 : f32 to vector<16x16xf32>
    %17 = arith.mulf %16, %15 : vector<16x16xf32>
    %18 = vector.broadcast %11 : vector<1x16xf32> to vector<16x16xf32>
    %19 = arith.subf %18, %17 : vector<16x16xf32>
    %cst_17 = arith.constant dense<0x7F800000> : vector<16xf32>
    %20 = vector.multi_reduction <minimumf>, %19, %cst_17 [1] : vector<16x16xf32> to vector<16xf32>
    %21 = vector.shape_cast %20 : vector<16xf32> to vector<16x1xf32>
    %22 = vector.broadcast %21 : vector<16x1xf32> to vector<16x16xf32>
    %23 = arith.cmpf oeq, %19, %22 : vector<16x16xf32>
    %c16_i32 = arith.constant 16 : i32
    %24 = vector.broadcast %c16_i32 : i32 to vector<16x16xi32>
    %25 = arith.select %23, %1, %24 : vector<16x16xi1>, vector<16x16xi32>
    %cst_18 = arith.constant dense<2147483647> : vector<16xi32>
    %26 = vector.multi_reduction <minsi>, %25, %cst_18 [1] : vector<16x16xi32> to vector<16xi32>
    %27 = vector.shape_cast %26 : vector<16xi32> to vector<16x1xi32>
    %28 = arith.addf %4, %21 : vector<16x1xf32>
    %29 = arith.mulf %14, %14 : vector<16x32xf32>
    %cst_19 = arith.constant dense<0.000000e+00> : vector<16xf32>
    %30 = vector.multi_reduction <add>, %29, %cst_19 [1] : vector<16x32xf32> to vector<16xf32>
    %31 = vector.shape_cast %30 : vector<16xf32> to vector<16x1xf32>
    %32 = arith.addf %28, %31 : vector<16x1xf32>
    %33 = vector.broadcast %27 : vector<16x1xi32> to vector<16x16xi32>
    %34 = arith.cmpi eq, %1, %33 : vector<16x16xi32>
    %35 = arith.extui %34 : vector<16x16xi1> to vector<16x16xi32>
    %36 = arith.sitofp %35 : vector<16x16xi32> to vector<16x16xf32>
    %cst_20 = arith.constant dense<0.000000e+00> : vector<16x8xf32>
    %37 = tpu.matmul %36, %13, %cst_20 {dimension_numbers = #tpu.dot_dimension_numbers<[1], [0], [0], [1], [0, 0, 1, 1], [], []>} : vector<16x16xf32>, vector<16x8xf32>, vector<16x8xf32> -> vector<16x8xf32>
    %38 = arith.addf %2, %37 : vector<16x8xf32>
    %c1_i32 = arith.constant 1 : i32
    %39 = vector.broadcast %c1_i32 : i32 to vector<16x1xi32>
    %40 = arith.muli %27, %39 : vector<16x1xi32>
    %41 = arith.addi %3, %40 : vector<16x1xi32>
    %c1_i32_21 = arith.constant 1 : i32
    %c16_i32_22 = arith.constant 16 : i32
    %42 = arith.muli %c1_i32_21, %c16_i32_22 : i32
    %43 = arith.subf %0, %38 : vector<16x8xf32>
    %c1 = arith.constant 1 : index
    %c0_23 = arith.constant 0 : index
    %c0_24 = arith.constant 0 : index
    %44 = vector.load %arg2[%c1, %c0_23, %c0_24] : memref<3x8x32xf32, #tpu.memory_space<vmem>>, vector<1x8x32xf32>
    %45 = vector.shape_cast %44 : vector<1x8x32xf32> to vector<8x32xf32>
    %c1_25 = arith.constant 1 : index
    %c0_26 = arith.constant 0 : index
    %c0_27 = arith.constant 0 : index
    %46 = vector.load %arg3[%c1_25, %c0_26, %c0_27] : memref<3x16x32xf32, #tpu.memory_space<vmem>>, vector<1x16x32xf32>
    %47 = vector.shape_cast %46 : vector<1x16x32xf32> to vector<16x32xf32>
    %c1_28 = arith.constant 1 : index
    %c0_29 = arith.constant 0 : index
    %c0_30 = arith.constant 0 : index
    %48 = vector.load %arg4[%c1_28, %c0_29, %c0_30] : memref<3x1x16xf32, #tpu.memory_space<vmem>>, vector<1x1x16xf32>
    %49 = vector.shape_cast %48 : vector<1x1x16xf32> to vector<1x16xf32>
    %c1_31 = arith.constant 1 : index
    %c0_32 = arith.constant 0 : index
    %c0_33 = arith.constant 0 : index
    %50 = vector.load %arg5[%c1_31, %c0_32, %c0_33] : memref<3x16x8xf32, #tpu.memory_space<vmem>>, vector<1x16x8xf32>
    %51 = vector.shape_cast %50 : vector<1x16x8xf32> to vector<16x8xf32>
    %cst_34 = arith.constant dense<0.000000e+00> : vector<16x32xf32>
    %52 = tpu.matmul %43, %45, %cst_34 {dimension_numbers = #tpu.dot_dimension_numbers<[1], [0], [0], [1], [0, 0, 1, 1], [], []>} : vector<16x8xf32>, vector<8x32xf32>, vector<16x32xf32> -> vector<16x32xf32>
    %cst_35 = arith.constant dense<0.000000e+00> : vector<16x16xf32>
    %53 = tpu.matmul %52, %47, %cst_35 {dimension_numbers = #tpu.dot_dimension_numbers<[1], [1], [0], [0], [0, 0, 1, 0], [], []>} : vector<16x32xf32>, vector<16x32xf32>, vector<16x16xf32> -> vector<16x16xf32>
    %cst_36 = arith.constant 2.000000e+00 : f32
    %54 = vector.broadcast %cst_36 : f32 to vector<16x16xf32>
    %55 = arith.mulf %54, %53 : vector<16x16xf32>
    %56 = vector.broadcast %49 : vector<1x16xf32> to vector<16x16xf32>
    %57 = arith.subf %56, %55 : vector<16x16xf32>
    %cst_37 = arith.constant dense<0x7F800000> : vector<16xf32>
    %58 = vector.multi_reduction <minimumf>, %57, %cst_37 [1] : vector<16x16xf32> to vector<16xf32>
    %59 = vector.shape_cast %58 : vector<16xf32> to vector<16x1xf32>
    %60 = vector.broadcast %59 : vector<16x1xf32> to vector<16x16xf32>
    %61 = arith.cmpf oeq, %57, %60 : vector<16x16xf32>
    %c16_i32_38 = arith.constant 16 : i32
    %62 = vector.broadcast %c16_i32_38 : i32 to vector<16x16xi32>
    %63 = arith.select %61, %1, %62 : vector<16x16xi1>, vector<16x16xi32>
    %cst_39 = arith.constant dense<2147483647> : vector<16xi32>
    %64 = vector.multi_reduction <minsi>, %63, %cst_39 [1] : vector<16x16xi32> to vector<16xi32>
    %65 = vector.shape_cast %64 : vector<16xi32> to vector<16x1xi32>
    %66 = arith.addf %32, %59 : vector<16x1xf32>
    %67 = arith.mulf %52, %52 : vector<16x32xf32>
    %cst_40 = arith.constant dense<0.000000e+00> : vector<16xf32>
    %68 = vector.multi_reduction <add>, %67, %cst_40 [1] : vector<16x32xf32> to vector<16xf32>
    %69 = vector.shape_cast %68 : vector<16xf32> to vector<16x1xf32>
    %70 = arith.addf %66, %69 : vector<16x1xf32>
    %71 = vector.broadcast %65 : vector<16x1xi32> to vector<16x16xi32>
    %72 = arith.cmpi eq, %1, %71 : vector<16x16xi32>
    %73 = arith.extui %72 : vector<16x16xi1> to vector<16x16xi32>
    %74 = arith.sitofp %73 : vector<16x16xi32> to vector<16x16xf32>
    %cst_41 = arith.constant dense<0.000000e+00> : vector<16x8xf32>
    %75 = tpu.matmul %74, %51, %cst_41 {dimension_numbers = #tpu.dot_dimension_numbers<[1], [0], [0], [1], [0, 0, 1, 1], [], []>} : vector<16x16xf32>, vector<16x8xf32>, vector<16x8xf32> -> vector<16x8xf32>
    %76 = arith.addf %38, %75 : vector<16x8xf32>
    %77 = vector.broadcast %42 : i32 to vector<16x1xi32>
    %78 = arith.muli %65, %77 : vector<16x1xi32>
    %79 = arith.addi %41, %78 : vector<16x1xi32>
    %c16_i32_42 = arith.constant 16 : i32
    %80 = arith.muli %42, %c16_i32_42 : i32
    %81 = arith.subf %0, %76 : vector<16x8xf32>
    %c2 = arith.constant 2 : index
    %c0_43 = arith.constant 0 : index
    %c0_44 = arith.constant 0 : index
    %82 = vector.load %arg2[%c2, %c0_43, %c0_44] : memref<3x8x32xf32, #tpu.memory_space<vmem>>, vector<1x8x32xf32>
    %83 = vector.shape_cast %82 : vector<1x8x32xf32> to vector<8x32xf32>
    %c2_45 = arith.constant 2 : index
    %c0_46 = arith.constant 0 : index
    %c0_47 = arith.constant 0 : index
    %84 = vector.load %arg3[%c2_45, %c0_46, %c0_47] : memref<3x16x32xf32, #tpu.memory_space<vmem>>, vector<1x16x32xf32>
    %85 = vector.shape_cast %84 : vector<1x16x32xf32> to vector<16x32xf32>
    %c2_48 = arith.constant 2 : index
    %c0_49 = arith.constant 0 : index
    %c0_50 = arith.constant 0 : index
    %86 = vector.load %arg4[%c2_48, %c0_49, %c0_50] : memref<3x1x16xf32, #tpu.memory_space<vmem>>, vector<1x1x16xf32>
    %87 = vector.shape_cast %86 : vector<1x1x16xf32> to vector<1x16xf32>
    %c2_51 = arith.constant 2 : index
    %c0_52 = arith.constant 0 : index
    %c0_53 = arith.constant 0 : index
    %88 = vector.load %arg5[%c2_51, %c0_52, %c0_53] : memref<3x16x8xf32, #tpu.memory_space<vmem>>, vector<1x16x8xf32>
    %89 = vector.shape_cast %88 : vector<1x16x8xf32> to vector<16x8xf32>
    %cst_54 = arith.constant dense<0.000000e+00> : vector<16x32xf32>
    %90 = tpu.matmul %81, %83, %cst_54 {dimension_numbers = #tpu.dot_dimension_numbers<[1], [0], [0], [1], [0, 0, 1, 1], [], []>} : vector<16x8xf32>, vector<8x32xf32>, vector<16x32xf32> -> vector<16x32xf32>
    %cst_55 = arith.constant dense<0.000000e+00> : vector<16x16xf32>
    %91 = tpu.matmul %90, %85, %cst_55 {dimension_numbers = #tpu.dot_dimension_numbers<[1], [1], [0], [0], [0, 0, 1, 0], [], []>} : vector<16x32xf32>, vector<16x32xf32>, vector<16x16xf32> -> vector<16x16xf32>
    %cst_56 = arith.constant 2.000000e+00 : f32
    %92 = vector.broadcast %cst_56 : f32 to vector<16x16xf32>
    %93 = arith.mulf %92, %91 : vector<16x16xf32>
    %94 = vector.broadcast %87 : vector<1x16xf32> to vector<16x16xf32>
    %95 = arith.subf %94, %93 : vector<16x16xf32>
    %cst_57 = arith.constant dense<0x7F800000> : vector<16xf32>
    %96 = vector.multi_reduction <minimumf>, %95, %cst_57 [1] : vector<16x16xf32> to vector<16xf32>
    %97 = vector.shape_cast %96 : vector<16xf32> to vector<16x1xf32>
    %98 = vector.broadcast %97 : vector<16x1xf32> to vector<16x16xf32>
    %99 = arith.cmpf oeq, %95, %98 : vector<16x16xf32>
    %c16_i32_58 = arith.constant 16 : i32
    %100 = vector.broadcast %c16_i32_58 : i32 to vector<16x16xi32>
    %101 = arith.select %99, %1, %100 : vector<16x16xi1>, vector<16x16xi32>
    %cst_59 = arith.constant dense<2147483647> : vector<16xi32>
    %102 = vector.multi_reduction <minsi>, %101, %cst_59 [1] : vector<16x16xi32> to vector<16xi32>
    %103 = vector.shape_cast %102 : vector<16xi32> to vector<16x1xi32>
    %104 = arith.addf %70, %97 : vector<16x1xf32>
    %105 = arith.mulf %90, %90 : vector<16x32xf32>
    %cst_60 = arith.constant dense<0.000000e+00> : vector<16xf32>
    %106 = vector.multi_reduction <add>, %105, %cst_60 [1] : vector<16x32xf32> to vector<16xf32>
    %107 = vector.shape_cast %106 : vector<16xf32> to vector<16x1xf32>
    %108 = arith.addf %104, %107 : vector<16x1xf32>
    %109 = vector.broadcast %103 : vector<16x1xi32> to vector<16x16xi32>
    %110 = arith.cmpi eq, %1, %109 : vector<16x16xi32>
    %111 = arith.extui %110 : vector<16x16xi1> to vector<16x16xi32>
    %112 = arith.sitofp %111 : vector<16x16xi32> to vector<16x16xf32>
    %cst_61 = arith.constant dense<0.000000e+00> : vector<16x8xf32>
    %113 = tpu.matmul %112, %89, %cst_61 {dimension_numbers = #tpu.dot_dimension_numbers<[1], [0], [0], [1], [0, 0, 1, 1], [], []>} : vector<16x16xf32>, vector<16x8xf32>, vector<16x8xf32> -> vector<16x8xf32>
    %114 = arith.addf %76, %113 : vector<16x8xf32>
    %115 = vector.broadcast %80 : i32 to vector<16x1xi32>
    %116 = arith.muli %103, %115 : vector<16x1xi32>
    %117 = arith.addi %79, %116 : vector<16x1xi32>
    %c0_62 = arith.constant 0 : index
    %c0_63 = arith.constant 0 : index
    %118 = vector.load %arg6[%c0_62, %c0_63] : memref<16x8xf32, #tpu.memory_space<vmem>>, vector<16x8xf32>
    tpu.vector_store %arg6[%c0_62, %c0_63], %114 {strides = array<i32>} : memref<16x8xf32, #tpu.memory_space<vmem>>, vector<16x8xf32>,
    %c0_64 = arith.constant 0 : index
    %c0_65 = arith.constant 0 : index
    %119 = vector.load %arg7[%c0_64, %c0_65] : memref<16x1xi32, #tpu.memory_space<vmem>>, vector<16x1xi32>
    tpu.vector_store %arg7[%c0_64, %c0_65], %117 {strides = array<i32>} : memref<16x1xi32, #tpu.memory_space<vmem>>, vector<16x1xi32>,
    %c16_i32_66 = arith.constant 16 : i32
    %120 = arith.muli %arg0, %c16_i32_66 : i32
    %121 = tpu.iota {dimensions = array<i32: 0>} : vector<16x1xi32>
    %122 = vector.broadcast %120 : i32 to vector<16x1xi32>
    %123 = arith.addi %122, %121 : vector<16x1xi32>
    %c16_i32_67 = arith.constant 16 : i32
    %124 = vector.broadcast %c16_i32_67 : i32 to vector<16x1xi32>
    %125 = arith.cmpi slt, %123, %124 : vector<16x1xi32>
    %126 = arith.extui %125 : vector<16x1xi1> to vector<16x1xi32>
    %127 = arith.sitofp %126 : vector<16x1xi32> to vector<16x1xf32>
    %128 = arith.mulf %108, %127 : vector<16x1xf32>
    %129 = vector.shape_cast %128 : vector<16x1xf32> to vector<1x16x1xf32>
    %cst_68 = arith.constant dense<0.000000e+00> : vector<1xf32>
    %130 = vector.multi_reduction <add>, %129, %cst_68 [1, 2] : vector<1x16x1xf32> to vector<1xf32>
    %131 = vector.shape_cast %130 : vector<1xf32> to vector<1x1x1xf32>
    %132 = vector.extract %131[0, 0, 0] : f32 from vector<1x1x1xf32>
    %133 = arith.subf %114, %0 : vector<16x8xf32>
    %134 = arith.mulf %133, %133 : vector<16x8xf32>
    %cst_69 = arith.constant dense<0.000000e+00> : vector<16xf32>
    %135 = vector.multi_reduction <add>, %134, %cst_69 [1] : vector<16x8xf32> to vector<16xf32>
    %136 = vector.shape_cast %135 : vector<16xf32> to vector<16x1xf32>
    %137 = arith.mulf %136, %127 : vector<16x1xf32>
    %138 = vector.shape_cast %137 : vector<16x1xf32> to vector<1x16x1xf32>
    %cst_70 = arith.constant dense<0.000000e+00> : vector<1xf32>
    %139 = vector.multi_reduction <add>, %138, %cst_70 [1, 2] : vector<1x16x1xf32> to vector<1xf32>
    %140 = vector.shape_cast %139 : vector<1xf32> to vector<1x1x1xf32>
    %141 = vector.extract %140[0, 0, 0] : f32 from vector<1x1x1xf32>
    %142 = tpu.iota {dimensions = array<i32: 2>} : vector<1x1x128xi32>
    %c0_i32_71 = arith.constant 0 : i32
    %143 = vector.broadcast %c0_i32_71 : i32 to vector<1x1x128xi32>
    %144 = arith.cmpi eq, %142, %143 : vector<1x1x128xi32>
    %c1_i32_72 = arith.constant 1 : i32
    %145 = vector.broadcast %c1_i32_72 : i32 to vector<1x1x128xi32>
    %146 = arith.cmpi eq, %142, %145 : vector<1x1x128xi32>
    %cst_73 = arith.constant 0.000000e+00 : f32
    %147 = vector.broadcast %141 : f32 to vector<1x1x128xf32>
    %148 = vector.broadcast %cst_73 : f32 to vector<1x1x128xf32>
    %149 = arith.select %146, %147, %148 : vector<1x1x128xi1>, vector<1x1x128xf32>
    %150 = vector.broadcast %132 : f32 to vector<1x1x128xf32>
    %151 = arith.select %144, %150, %149 : vector<1x1x128xi1>, vector<1x1x128xf32>
    %c0_74 = arith.constant 0 : index
    %c0_75 = arith.constant 0 : index
    %c0_76 = arith.constant 0 : index
    %152 = vector.load %arg8[%c0_74, %c0_75, %c0_76] : memref<1x1x128xf32, #tpu.memory_space<vmem>>, vector<1x1x128xf32>
    tpu.vector_store %arg8[%c0_74, %c0_75, %c0_76], %151 {strides = array<i32>} : memref<1x1x128xf32, #tpu.memory_space<vmem>>, vector<1x1x128xf32>,
    return
  }
  func.func @transform_0(%arg0: i32) -> (i32, i32) {
    %c0_i32 = arith.constant 0 : i32
    %c0_i32_0 = arith.constant 0 : i32
    return %arg0, %c0_i32 : i32, i32
  }
  func.func @transform_1(%arg0: i32) -> (i32, i32, i32) {
    %c0_i32 = arith.constant 0 : i32
    %c0_i32_0 = arith.constant 0 : i32
    %c0_i32_1 = arith.constant 0 : i32
    %c0_i32_2 = arith.constant 0 : i32
    return %c0_i32, %c0_i32_0, %c0_i32_1 : i32, i32, i32
  }
  func.func @transform_2(%arg0: i32) -> (i32, i32, i32) {
    %c0_i32 = arith.constant 0 : i32
    %c0_i32_0 = arith.constant 0 : i32
    %c0_i32_1 = arith.constant 0 : i32
    %c0_i32_2 = arith.constant 0 : i32
    return %c0_i32, %c0_i32_0, %c0_i32_1 : i32, i32, i32
  }
  func.func @transform_3(%arg0: i32) -> (i32, i32, i32) {
    %c0_i32 = arith.constant 0 : i32
    %c0_i32_0 = arith.constant 0 : i32
    %c0_i32_1 = arith.constant 0 : i32
    %c0_i32_2 = arith.constant 0 : i32
    return %c0_i32, %c0_i32_0, %c0_i32_1 : i32, i32, i32
  }
  func.func @transform_4(%arg0: i32) -> (i32, i32, i32) {
    %c0_i32 = arith.constant 0 : i32
    %c0_i32_0 = arith.constant 0 : i32
    %c0_i32_1 = arith.constant 0 : i32
    %c0_i32_2 = arith.constant 0 : i32
    return %c0_i32, %c0_i32_0, %c0_i32_1 : i32, i32, i32
  }
  func.func @transform_5(%arg0: i32) -> (i32, i32) {
    %c0_i32 = arith.constant 0 : i32
    %c0_i32_0 = arith.constant 0 : i32
    return %arg0, %c0_i32 : i32, i32
  }
  func.func @transform_6(%arg0: i32) -> (i32, i32) {
    %c0_i32 = arith.constant 0 : i32
    %c0_i32_0 = arith.constant 0 : i32
    return %arg0, %c0_i32 : i32, i32
  }
  func.func @transform_7(%arg0: i32) -> (i32, i32, i32) {
    %c0_i32 = arith.constant 0 : i32
    %c0_i32_0 = arith.constant 0 : i32
    %c0_i32_1 = arith.constant 0 : i32
    return %arg0, %c0_i32, %c0_i32_0 : i32, i32, i32
  }
}

module attributes {stable_mosaic.version = 11 : i64} {
  func.func @_rvq_kernel(%arg0: i32, %arg1: memref<16x8xf32, #tpu.memory_space<vmem>>, %arg2: memref<3x8x32xf32, #tpu.memory_space<vmem>>, %arg3: memref<3x16x32xf32, #tpu.memory_space<vmem>>, %arg4: memref<3x1x16xf32, #tpu.memory_space<vmem>>, %arg5: memref<3x16x8xf32, #tpu.memory_space<vmem>>, %arg6: memref<16x8xf32, #tpu.memory_space<vmem>>, %arg7: memref<16x1xi32, #tpu.memory_space<vmem>>, %arg8: memref<1x1x128xf32, #tpu.memory_space<vmem>>) attributes {dimension_semantics = [#tpu.dimension_semantics<parallel>], iteration_bounds = array<i64: 1>, scalar_prefetch = 0 : i64, scratch_operands = 0 : i64, tpu.core_type = #tpu.core_type<tc>, window_params = [{transform_indices = @transform_0, window_bounds = array<i64: 16, 8>}, {pipeline_mode = #tpu.pipeline_mode<synchronous>, transform_indices = @transform_1, window_bounds = array<i64: 3, 8, 32>}, {pipeline_mode = #tpu.pipeline_mode<synchronous>, transform_indices = @transform_2, window_bounds = array<i64: 3, 16, 32>}, {pipeline_mode = #tpu.pipeline_mode<synchronous>, transform_indices = @transform_3, window_bounds = array<i64: 3, 1, 16>}, {pipeline_mode = #tpu.pipeline_mode<synchronous>, transform_indices = @transform_4, window_bounds = array<i64: 3, 16, 8>}, {transform_indices = @transform_5, window_bounds = array<i64: 16, 8>}, {transform_indices = @transform_6, window_bounds = array<i64: 16, 1>}, {transform_indices = @transform_7, window_bounds = array<i64: 1, 1, 128>}]} {
    %c0 = arith.constant 0 : index
    %c0_0 = arith.constant 0 : index
    %0 = vector.load %arg1[%c0, %c0_0] : memref<16x8xf32, #tpu.memory_space<vmem>>, vector<16x8xf32>
    %1 = tpu.iota {dimensions = array<i32: 1>} : vector<16x16xi32>
    %cst = arith.constant 0.000000e+00 : f32
    %2 = vector.broadcast %cst : f32 to vector<16x8xf32>
    %c0_i32 = arith.constant 0 : i32
    %3 = vector.broadcast %c0_i32 : i32 to vector<16x1xi32>
    %cst_1 = arith.constant 0.000000e+00 : f32
    %4 = vector.broadcast %cst_1 : f32 to vector<16x1xf32>
    %5 = arith.subf %0, %2 : vector<16x8xf32>
    %c0_2 = arith.constant 0 : index
    %c0_3 = arith.constant 0 : index
    %c0_4 = arith.constant 0 : index
    %6 = vector.load %arg2[%c0_2, %c0_3, %c0_4] : memref<3x8x32xf32, #tpu.memory_space<vmem>>, vector<1x8x32xf32>
    %7 = vector.shape_cast %6 : vector<1x8x32xf32> to vector<8x32xf32>
    %c0_5 = arith.constant 0 : index
    %c0_6 = arith.constant 0 : index
    %c0_7 = arith.constant 0 : index
    %8 = vector.load %arg3[%c0_5, %c0_6, %c0_7] : memref<3x16x32xf32, #tpu.memory_space<vmem>>, vector<1x16x32xf32>
    %9 = vector.shape_cast %8 : vector<1x16x32xf32> to vector<16x32xf32>
    %c0_8 = arith.constant 0 : index
    %c0_9 = arith.constant 0 : index
    %c0_10 = arith.constant 0 : index
    %10 = vector.load %arg4[%c0_8, %c0_9, %c0_10] : memref<3x1x16xf32, #tpu.memory_space<vmem>>, vector<1x1x16xf32>
    %11 = vector.shape_cast %10 : vector<1x1x16xf32> to vector<1x16xf32>
    %c0_11 = arith.constant 0 : index
    %c0_12 = arith.constant 0 : index
    %c0_13 = arith.constant 0 : index
    %12 = vector.load %arg5[%c0_11, %c0_12, %c0_13] : memref<3x16x8xf32, #tpu.memory_space<vmem>>, vector<1x16x8xf32>
    %13 = vector.shape_cast %12 : vector<1x16x8xf32> to vector<16x8xf32>
    %cst_14 = arith.constant dense<0.000000e+00> : vector<16x32xf32>
    %14 = tpu.matmul %5, %7, %cst_14 {dimension_numbers = #tpu.dot_dimension_numbers<[1], [0], [0], [1], [0, 0, 1, 1], [], []>} : vector<16x8xf32>, vector<8x32xf32>, vector<16x32xf32> -> vector<16x32xf32>
    %cst_15 = arith.constant dense<0.000000e+00> : vector<16x16xf32>
    %15 = tpu.matmul %14, %9, %cst_15 {dimension_numbers = #tpu.dot_dimension_numbers<[1], [1], [0], [0], [0, 0, 1, 0], [], []>} : vector<16x32xf32>, vector<16x32xf32>, vector<16x16xf32> -> vector<16x16xf32>
    %cst_16 = arith.constant 2.000000e+00 : f32
    %16 = vector.broadcast %cst_16 : f32 to vector<16x16xf32>
    %17 = arith.mulf %16, %15 : vector<16x16xf32>
    %18 = vector.broadcast %11 : vector<1x16xf32> to vector<16x16xf32>
    %19 = arith.subf %18, %17 : vector<16x16xf32>
    %cst_17 = arith.constant dense<0x7F800000> : vector<16xf32>
    %20 = vector.multi_reduction <minimumf>, %19, %cst_17 [1] : vector<16x16xf32> to vector<16xf32>
    %21 = vector.shape_cast %20 : vector<16xf32> to vector<16x1xf32>
    %22 = vector.broadcast %21 : vector<16x1xf32> to vector<16x16xf32>
    %23 = arith.cmpf oeq, %19, %22 : vector<16x16xf32>
    %c16_i32 = arith.constant 16 : i32
    %24 = vector.broadcast %c16_i32 : i32 to vector<16x16xi32>
    %25 = arith.select %23, %1, %24 : vector<16x16xi1>, vector<16x16xi32>
    %cst_18 = arith.constant dense<2147483647> : vector<16xi32>
    %26 = vector.multi_reduction <minsi>, %25, %cst_18 [1] : vector<16x16xi32> to vector<16xi32>
    %27 = vector.shape_cast %26 : vector<16xi32> to vector<16x1xi32>
    %28 = arith.addf %4, %21 : vector<16x1xf32>
    %29 = arith.mulf %14, %14 : vector<16x32xf32>
    %cst_19 = arith.constant dense<0.000000e+00> : vector<16xf32>
    %30 = vector.multi_reduction <add>, %29, %cst_19 [1] : vector<16x32xf32> to vector<16xf32>
    %31 = vector.shape_cast %30 : vector<16xf32> to vector<16x1xf32>
    %32 = arith.addf %28, %31 : vector<16x1xf32>
    %33 = vector.broadcast %27 : vector<16x1xi32> to vector<16x16xi32>
    %34 = arith.cmpi eq, %1, %33 : vector<16x16xi32>
    %35 = arith.extui %34 : vector<16x16xi1> to vector<16x16xi32>
    %36 = arith.sitofp %35 : vector<16x16xi32> to vector<16x16xf32>
    %cst_20 = arith.constant dense<0.000000e+00> : vector<16x8xf32>
    %37 = tpu.matmul %36, %13, %cst_20 {dimension_numbers = #tpu.dot_dimension_numbers<[1], [0], [0], [1], [0, 0, 1, 1], [], []>} : vector<16x16xf32>, vector<16x8xf32>, vector<16x8xf32> -> vector<16x8xf32>
    %38 = arith.addf %2, %37 : vector<16x8xf32>
    %c1_i32 = arith.constant 1 : i32
    %39 = vector.broadcast %c1_i32 : i32 to vector<16x1xi32>
    %40 = arith.muli %27, %39 : vector<16x1xi32>
    %41 = arith.addi %3, %40 : vector<16x1xi32>
    %c1_i32_21 = arith.constant 1 : i32
    %c16_i32_22 = arith.constant 16 : i32
    %42 = arith.muli %c1_i32_21, %c16_i32_22 : i32
    %43 = arith.subf %0, %38 : vector<16x8xf32>
    %c1 = arith.constant 1 : index
    %c0_23 = arith.constant 0 : index
    %c0_24 = arith.constant 0 : index
    %44 = vector.load %arg2[%c1, %c0_23, %c0_24] : memref<3x8x32xf32, #tpu.memory_space<vmem>>, vector<1x8x32xf32>
    %45 = vector.shape_cast %44 : vector<1x8x32xf32> to vector<8x32xf32>
    %c1_25 = arith.constant 1 : index
    %c0_26 = arith.constant 0 : index
    %c0_27 = arith.constant 0 : index
    %46 = vector.load %arg3[%c1_25, %c0_26, %c0_27] : memref<3x16x32xf32, #tpu.memory_space<vmem>>, vector<1x16x32xf32>
    %47 = vector.shape_cast %46 : vector<1x16x32xf32> to vector<16x32xf32>
    %c1_28 = arith.constant 1 : index
    %c0_29 = arith.constant 0 : index
    %c0_30 = arith.constant 0 : index
    %48 = vector.load %arg4[%c1_28, %c0_29, %c0_30] : memref<3x1x16xf32, #tpu.memory_space<vmem>>, vector<1x1x16xf32>
    %49 = vector.shape_cast %48 : vector<1x1x16xf32> to vector<1x16xf32>
    %c1_31 = arith.constant 1 : index
    %c0_32 = arith.constant 0 : index
    %c0_33 = arith.constant 0 : index
    %50 = vector.load %arg5[%c1_31, %c0_32, %c0_33] : memref<3x16x8xf32, #tpu.memory_space<vmem>>, vector<1x16x8xf32>
    %51 = vector.shape_cast %50 : vector<1x16x8xf32> to vector<16x8xf32>
    %cst_34 = arith.constant dense<0.000000e+00> : vector<16x32xf32>
    %52 = tpu.matmul %43, %45, %cst_34 {dimension_numbers = #tpu.dot_dimension_numbers<[1], [0], [0], [1], [0, 0, 1, 1], [], []>} : vector<16x8xf32>, vector<8x32xf32>, vector<16x32xf32> -> vector<16x32xf32>
    %cst_35 = arith.constant dense<0.000000e+00> : vector<16x16xf32>
    %53 = tpu.matmul %52, %47, %cst_35 {dimension_numbers = #tpu.dot_dimension_numbers<[1], [1], [0], [0], [0, 0, 1, 0], [], []>} : vector<16x32xf32>, vector<16x32xf32>, vector<16x16xf32> -> vector<16x16xf32>
    %cst_36 = arith.constant 2.000000e+00 : f32
    %54 = vector.broadcast %cst_36 : f32 to vector<16x16xf32>
    %55 = arith.mulf %54, %53 : vector<16x16xf32>
    %56 = vector.broadcast %49 : vector<1x16xf32> to vector<16x16xf32>
    %57 = arith.subf %56, %55 : vector<16x16xf32>
    %cst_37 = arith.constant dense<0x7F800000> : vector<16xf32>
    %58 = vector.multi_reduction <minimumf>, %57, %cst_37 [1] : vector<16x16xf32> to vector<16xf32>
    %59 = vector.shape_cast %58 : vector<16xf32> to vector<16x1xf32>
    %60 = vector.broadcast %59 : vector<16x1xf32> to vector<16x16xf32>
    %61 = arith.cmpf oeq, %57, %60 : vector<16x16xf32>
    %c16_i32_38 = arith.constant 16 : i32
    %62 = vector.broadcast %c16_i32_38 : i32 to vector<16x16xi32>
    %63 = arith.select %61, %1, %62 : vector<16x16xi1>, vector<16x16xi32>
    %cst_39 = arith.constant dense<2147483647> : vector<16xi32>
    %64 = vector.multi_reduction <minsi>, %63, %cst_39 [1] : vector<16x16xi32> to vector<16xi32>
    %65 = vector.shape_cast %64 : vector<16xi32> to vector<16x1xi32>
    %66 = arith.addf %32, %59 : vector<16x1xf32>
    %67 = arith.mulf %52, %52 : vector<16x32xf32>
    %cst_40 = arith.constant dense<0.000000e+00> : vector<16xf32>
    %68 = vector.multi_reduction <add>, %67, %cst_40 [1] : vector<16x32xf32> to vector<16xf32>
    %69 = vector.shape_cast %68 : vector<16xf32> to vector<16x1xf32>
    %70 = arith.addf %66, %69 : vector<16x1xf32>
    %71 = vector.broadcast %65 : vector<16x1xi32> to vector<16x16xi32>
    %72 = arith.cmpi eq, %1, %71 : vector<16x16xi32>
    %73 = arith.extui %72 : vector<16x16xi1> to vector<16x16xi32>
    %74 = arith.sitofp %73 : vector<16x16xi32> to vector<16x16xf32>
    %cst_41 = arith.constant dense<0.000000e+00> : vector<16x8xf32>
    %75 = tpu.matmul %74, %51, %cst_41 {dimension_numbers = #tpu.dot_dimension_numbers<[1], [0], [0], [1], [0, 0, 1, 1], [], []>} : vector<16x16xf32>, vector<16x8xf32>, vector<16x8xf32> -> vector<16x8xf32>
    %76 = arith.addf %38, %75 : vector<16x8xf32>
    %77 = vector.broadcast %42 : i32 to vector<16x1xi32>
    %78 = arith.muli %65, %77 : vector<16x1xi32>
    %79 = arith.addi %41, %78 : vector<16x1xi32>
    %c16_i32_42 = arith.constant 16 : i32
    %80 = arith.muli %42, %c16_i32_42 : i32
    %81 = arith.subf %0, %76 : vector<16x8xf32>
    %c2 = arith.constant 2 : index
    %c0_43 = arith.constant 0 : index
    %c0_44 = arith.constant 0 : index
    %82 = vector.load %arg2[%c2, %c0_43, %c0_44] : memref<3x8x32xf32, #tpu.memory_space<vmem>>, vector<1x8x32xf32>
    %83 = vector.shape_cast %82 : vector<1x8x32xf32> to vector<8x32xf32>
    %c2_45 = arith.constant 2 : index
    %c0_46 = arith.constant 0 : index
    %c0_47 = arith.constant 0 : index
    %84 = vector.load %arg3[%c2_45, %c0_46, %c0_47] : memref<3x16x32xf32, #tpu.memory_space<vmem>>, vector<1x16x32xf32>
    %85 = vector.shape_cast %84 : vector<1x16x32xf32> to vector<16x32xf32>
    %c2_48 = arith.constant 2 : index
    %c0_49 = arith.constant 0 : index
    %c0_50 = arith.constant 0 : index
    %86 = vector.load %arg4[%c2_48, %c0_49, %c0_50] : memref<3x1x16xf32, #tpu.memory_space<vmem>>, vector<1x1x16xf32>
    %87 = vector.shape_cast %86 : vector<1x1x16xf32> to vector<1x16xf32>
    %c2_51 = arith.constant 2 : index
    %c0_52 = arith.constant 0 : index
    %c0_53 = arith.constant 0 : index
    %88 = vector.load %arg5[%c2_51, %c0_52, %c0_53] : memref<3x16x8xf32, #tpu.memory_space<vmem>>, vector<1x16x8xf32>
    %89 = vector.shape_cast %88 : vector<1x16x8xf32> to vector<16x8xf32>
    %cst_54 = arith.constant dense<0.000000e+00> : vector<16x32xf32>
    %90 = tpu.matmul %81, %83, %cst_54 {dimension_numbers = #tpu.dot_dimension_numbers<[1], [0], [0], [1], [0, 0, 1, 1], [], []>} : vector<16x8xf32>, vector<8x32xf32>, vector<16x32xf32> -> vector<16x32xf32>
    %cst_55 = arith.constant dense<0.000000e+00> : vector<16x16xf32>
    %91 = tpu.matmul %90, %85, %cst_55 {dimension_numbers = #tpu.dot_dimension_numbers<[1], [1], [0], [0], [0, 0, 1, 0], [], []>} : vector<16x32xf32>, vector<16x32xf32>, vector<16x16xf32> -> vector<16x16xf32>
    %cst_56 = arith.constant 2.000000e+00 : f32
    %92 = vector.broadcast %cst_56 : f32 to vector<16x16xf32>
    %93 = arith.mulf %92, %91 : vector<16x16xf32>
    %94 = vector.broadcast %87 : vector<1x16xf32> to vector<16x16xf32>
    %95 = arith.subf %94, %93 : vector<16x16xf32>
    %cst_57 = arith.constant dense<0x7F800000> : vector<16xf32>
    %96 = vector.multi_reduction <minimumf>, %95, %cst_57 [1] : vector<16x16xf32> to vector<16xf32>
    %97 = vector.shape_cast %96 : vector<16xf32> to vector<16x1xf32>
    %98 = vector.broadcast %97 : vector<16x1xf32> to vector<16x16xf32>
    %99 = arith.cmpf oeq, %95, %98 : vector<16x16xf32>
    %c16_i32_58 = arith.constant 16 : i32
    %100 = vector.broadcast %c16_i32_58 : i32 to vector<16x16xi32>
    %101 = arith.select %99, %1, %100 : vector<16x16xi1>, vector<16x16xi32>
    %cst_59 = arith.constant dense<2147483647> : vector<16xi32>
    %102 = vector.multi_reduction <minsi>, %101, %cst_59 [1] : vector<16x16xi32> to vector<16xi32>
    %103 = vector.shape_cast %102 : vector<16xi32> to vector<16x1xi32>
    %104 = arith.addf %70, %97 : vector<16x1xf32>
    %105 = arith.mulf %90, %90 : vector<16x32xf32>
    %cst_60 = arith.constant dense<0.000000e+00> : vector<16xf32>
    %106 = vector.multi_reduction <add>, %105, %cst_60 [1] : vector<16x32xf32> to vector<16xf32>
    %107 = vector.shape_cast %106 : vector<16xf32> to vector<16x1xf32>
    %108 = arith.addf %104, %107 : vector<16x1xf32>
    %109 = vector.broadcast %103 : vector<16x1xi32> to vector<16x16xi32>
    %110 = arith.cmpi eq, %1, %109 : vector<16x16xi32>
    %111 = arith.extui %110 : vector<16x16xi1> to vector<16x16xi32>
    %112 = arith.sitofp %111 : vector<16x16xi32> to vector<16x16xf32>
    %cst_61 = arith.constant dense<0.000000e+00> : vector<16x8xf32>
    %113 = tpu.matmul %112, %89, %cst_61 {dimension_numbers = #tpu.dot_dimension_numbers<[1], [0], [0], [1], [0, 0, 1, 1], [], []>} : vector<16x16xf32>, vector<16x8xf32>, vector<16x8xf32> -> vector<16x8xf32>
    %114 = arith.addf %76, %113 : vector<16x8xf32>
    %115 = vector.broadcast %80 : i32 to vector<16x1xi32>
    %116 = arith.muli %103, %115 : vector<16x1xi32>
    %117 = arith.addi %79, %116 : vector<16x1xi32>
    %c0_62 = arith.constant 0 : index
    %c0_63 = arith.constant 0 : index
    %118 = vector.load %arg6[%c0_62, %c0_63] : memref<16x8xf32, #tpu.memory_space<vmem>>, vector<16x8xf32>
    tpu.vector_store %arg6[%c0_62, %c0_63], %114 {strides = array<i32>} : memref<16x8xf32, #tpu.memory_space<vmem>>, vector<16x8xf32>,
    %c0_64 = arith.constant 0 : index
    %c0_65 = arith.constant 0 : index
    %119 = vector.load %arg7[%c0_64, %c0_65] : memref<16x1xi32, #tpu.memory_space<vmem>>, vector<16x1xi32>
    tpu.vector_store %arg7[%c0_64, %c0_65], %117 {strides = array<i32>} : memref<16x1xi32, #tpu.memory_space<vmem>>, vector<16x1xi32>,
    %c16_i32_66 = arith.constant 16 : i32
    %120 = arith.muli %arg0, %c16_i32_66 : i32
    %121 = tpu.iota {dimensions = array<i32: 0>} : vector<16x1xi32>
    %122 = vector.broadcast %120 : i32 to vector<16x1xi32>
    %123 = arith.addi %122, %121 : vector<16x1xi32>
    %c16_i32_67 = arith.constant 16 : i32
    %124 = vector.broadcast %c16_i32_67 : i32 to vector<16x1xi32>
    %125 = arith.cmpi slt, %123, %124 : vector<16x1xi32>
    %126 = arith.extui %125 : vector<16x1xi1> to vector<16x1xi32>
    %127 = arith.sitofp %126 : vector<16x1xi32> to vector<16x1xf32>
    %128 = arith.mulf %108, %127 : vector<16x1xf32>
    %129 = vector.shape_cast %128 : vector<16x1xf32> to vector<1x16x1xf32>
    %cst_68 = arith.constant dense<0.000000e+00> : vector<1xf32>
    %130 = vector.multi_reduction <add>, %129, %cst_68 [1, 2] : vector<1x16x1xf32> to vector<1xf32>
    %131 = vector.shape_cast %130 : vector<1xf32> to vector<1x1x1xf32>
    %132 = vector.extract %131[0, 0, 0] : f32 from vector<1x1x1xf32>
    %133 = arith.subf %114, %0 : vector<16x8xf32>
    %134 = arith.mulf %133, %133 : vector<16x8xf32>
    %cst_69 = arith.constant dense<0.000000e+00> : vector<16xf32>
    %135 = vector.multi_reduction <add>, %134, %cst_69 [1] : vector<16x8xf32> to vector<16xf32>
    %136 = vector.shape_cast %135 : vector<16xf32> to vector<16x1xf32>
    %137 = arith.mulf %136, %127 : vector<16x1xf32>
    %138 = vector.shape_cast %137 : vector<16x1xf32> to vector<1x16x1xf32>
    %cst_70 = arith.constant dense<0.000000e+00> : vector<1xf32>
    %139 = vector.multi_reduction <add>, %138, %cst_70 [1, 2] : vector<1x16x1xf32> to vector<1xf32>
    %140 = vector.shape_cast %139 : vector<1xf32> to vector<1x1x1xf32>
    %141 = vector.extract %140[0, 0, 0] : f32 from vector<1x1x1xf32>
    %142 = tpu.iota {dimensions = array<i32: 2>} : vector<1x1x128xi32>
    %c0_i32_71 = arith.constant 0 : i32
    %143 = vector.broadcast %c0_i32_71 : i32 to vector<1x1x128xi32>
    %144 = arith.cmpi eq, %142, %143 : vector<1x1x128xi32>
    %c1_i32_72 = arith.constant 1 : i32
    %145 = vector.broadcast %c1_i32_72 : i32 to vector<1x1x128xi32>
    %146 = arith.cmpi eq, %142, %145 : vector<1x1x128xi32>
    %cst_73 = arith.constant 0.000000e+00 : f32
    %147 = vector.broadcast %141 : f32 to vector<1x1x128xf32>
    %148 = vector.broadcast %cst_73 : f32 to vector<1x1x128xf32>
    %149 = arith.select %146, %147, %148 : vector<1x1x128xi1>, vector<1x1x128xf32>
    %150 = vector.broadcast %132 : f32 to vector<1x1x128xf32>
    %151 = arith.select %144, %150, %149 : vector<1x1x128xi1>, vector<1x1x128xf32>
    %c0_74 = arith.constant 0 : index
    %c0_75 = arith.constant 0 : index
    %c0_76 = arith.constant 0 : index
    %152 = vector.load %arg8[%c0_74, %c0_75, %c0_76] : memref<1x1x128xf32, #tpu.memory_space<vmem>>, vector<1x1x128xf32>
    tpu.vector_store %arg8[%c0_74, %c0_75, %c0_76], %151 {strides = array<i32>} : memref<1x1x128xf32, #tpu.memory_space<vmem>>, vector<1x1x128xf32>,
    return
  }
  func.func @transform_0(%arg0: i32) -> (i32, i32) {
    %c0_i32 = arith.constant 0 : i32
    %c0_i32_0 = arith.constant 0 : i32
    return %arg0, %c0_i32 : i32, i32
  }
  func.func @transform_1(%arg0: i32) -> (i32, i32, i32) {
    %c0_i32 = arith.constant 0 : i32
    %c0_i32_0 = arith.constant 0 : i32
    %c0_i32_1 = arith.constant 0 : i32
    %c0_i32_2 = arith.constant 0 : i32
    return %c0_i32, %c0_i32_0, %c0_i32_1 : i32, i32, i32
  }
  func.func @transform_2(%arg0: i32) -> (i32, i32, i32) {
    %c0_i32 = arith.constant 0 : i32
    %c0_i32_0 = arith.constant 0 : i32
    %c0_i32_1 = arith.constant 0 : i32
    %c0_i32_2 = arith.constant 0 : i32
    return %c0_i32, %c0_i32_0, %c0_i32_1 : i32, i32, i32
  }
  func.func @transform_3(%arg0: i32) -> (i32, i32, i32) {
    %c0_i32 = arith.constant 0 : i32
    %c0_i32_0 = arith.constant 0 : i32
    %c0_i32_1 = arith.constant 0 : i32
    %c0_i32_2 = arith.constant 0 : i32
    return %c0_i32, %c0_i32_0, %c0_i32_1 : i32, i32, i32
  }
  func.func @transform_4(%arg0: i32) -> (i32, i32, i32) {
    %c0_i32 = arith.constant 0 : i32
    %c0_i32_0 = arith.constant 0 : i32
    %c0_i32_1 = arith.constant 0 : i32
    %c0_i32_2 = arith.constant 0 : i32
    return %c0_i32, %c0_i32_0, %c0_i32_1 : i32, i32, i32
  }
  func.func @transform_5(%arg0: i32) -> (i32, i32) {
    %c0_i32 = arith.constant 0 : i32
    %c0_i32_0 = arith.constant 0 : i32
    return %arg0, %c0_i32 : i32, i32
  }
  func.func @transform_6(%arg0: i32) -> (i32, i32) {
    %c0_i32 = arith.constant 0 : i32
    %c0_i32_0 = arith.constant 0 : i32
    return %arg0, %c0_i32 : i32, i32
  }
  func.func @transform_7(%arg0: i32) -> (i32, i32, i32) {
    %c0_i32 = arith.constant 0 : i32
    %c0_i32_0 = arith.constant 0 : i32
    %c0_i32_1 = arith.constant 0 : i32
    return %arg0, %c0_i32, %c0_i32_0 : i32, i32, i32
  }
}

</mosaic_0001>

<bundles_post_ra>
// kernel: tpu_custom_call.1
= control target key start
LH: loop header
LB: loop body
LE: loop exit
PB: predicated region body
PF: predicated region fallthrough
CT: control target
= control target key end

     0   :  { %vm34_vm0 = vcmask 64512   ;;  %vm116_vm1 = vcmask 261120   ;;  %s1604_s0 = inlined_call_operand.vmem [shape: f32[16,8], index: 0, kind: input, shape index: {}]   ;;  %s1605_s1 = inlined_call_operand.vmem [shape: f32[3,8,32], index: 1, kind: input, shape index: {}]   ;;  %s1606_s2 = inlined_call_operand.vmem [shape: f32[3,16,32], index: 2, kind: input, shape index: {}]   ;;  %s1607_s3 = inlined_call_operand.vmem [shape: f32[3,1,16], index: 3, kind: input, shape index: {}]   ;;  %s1608_s4 = inlined_call_operand.vmem [shape: f32[3,16,8], index: 4, kind: input, shape index: {}]   ;;  %s1609_s5 = inlined_call_operand.vmem [shape: f32[16,8], index: 5, kind: output, shape index: {0}]   ;;  %s1610_s6 = inlined_call_operand.vmem [shape: s32[16,1], index: 6, kind: output, shape index: {1}]   ;;  %s1611_s7 = inlined_call_operand.hbm [shape: f32[1,1,128], index: 7, kind: output, shape index: {2}]  }
   0x1   :  { %v28_v0 = vld [vmem:[%s1605_s1] sm:$0xff]  ;;  %v1357_v2 = vld [vmem:[%s1604_s0 + $0x8] sm:$0xff]  ;;  %vm1369_vm2 = vmpackc.low %vm116_vm1, %vm116_vm1 }
   0x2   :  { %v1352_v1 = vld [vmem:[%s1604_s0] sm:$0xff]  ;;  %1187 = vmatprep.subr.mxu0 %v28_v0  ;;  %v30_v4 = vld [vmem:[%s1606_s2 + $0x8] sm:$0xff] }
   0x3   :  { %1189 = vmatprep.mubr.msk.f32.mxu0 %vm34_vm0, %v1352_v1  ;;  %v29_v3 = vld [vmem:[%s1606_s2] sm:$0xff]  ;;  %1188 = vmatpush3.msra.mxu0 %v28_v0 }
   0x4   :  { %v1244_v6 = vpack.c.bf16 %v30_v4, %v29_v3 }
   0x5   :  { %13 = vsyncpa [#allocation3], 0  ;;  %1190 = vmatmul.mubr.msk.f32.vlgmr.msra.gmra.mrb[0].mxu0 %vm34_vm0, %v1357_v2  ;;  %v1115_v11 = vld [vmem:[%s1607_s3] ss:$0 sm:$0xff]  ;;  %vm214_vm3 = vcmask 130048   ;;  %v26_v18 = vlaneseq  ;;  %v33_v39 = vld [vmem:[%s1608_s4 + $0x8] sm:$0xff] }
   0x6   :  { %1246 = vmatprep.subr.msk.bf16.mxu1 %vm1369_vm2, %v1244_v6  ;;  %v32_v38 = vld [vmem:[%s1608_s4] sm:$0xff]  ;;  %v1304_v50 = vmov 0.0   ;;  %v1120_v54 = vld [vmem:[%s1605_s1 + $0x8] sm:$0xff]  ;;  %v1121_v55 = vld [vmem:[%s1606_s2 + $0x10] sm:$0xff]  ;;  %s1305_s19 = smov [#allocation2]  }
   0x7   :  { %1249 = vmatpush3.bf16.xpose.msk.msra.mxu1 %vm1369_vm2, %v1244_v6  ;;  %v1392_v19 = vand.u32 127, %v26_v18  ;;  %v1250_v40 = vpack.c.bf16 %v33_v39, %v32_v38  ;;  %v1122_v56 = vld [vmem:[%s1606_s2 + $0x18] sm:$0xff]  ;;  %v1132_v3 = vld [vmem:[%s1607_s3 + $0x1] ss:$0 sm:$0xff]  ;;  %s1097_s20 = sshll.u32 %s1305_s19, 4  ;;  %s1098_s20 = int_to_ptr.vmem [resolvable:$true] %s1097_s20 }
   0x8   :  { %v1254_v57 = vpack.c.bf16 %v1122_v56, %v1121_v55  ;;  %v1139_v55 = vld [vmem:[%s1606_s2 + $0x28] sm:$0xff]  ;;  %s1280_s22 = scalar_lea.vmem %s1098_s20, 16  ;;  %s1284_s23 = scalar_lea.vmem %s1098_s20, 32 }
   0x9   :  { %1251 = vmatprep.subr.bf16.mxu0 %v1250_v40  ;;  %p1281_p0 = scmp.ne.s32.totalorder %s1098_s20, %s1280_s22  ;;  %p1285_p1 = scmp.lt.s32.totalorder %s1098_s20, %s1098_s20 }
   0xa   :  { %1253 = vmatpush3.bf16.msra.mxu0 %v1250_v40  ;;  %1256 = vmatprep.subr.msk.bf16.mxu1 %vm1369_vm2, %v1254_v57  ;;  %p1286_p2 = scmp.lt.s32.totalorder %s1284_s23, %s1280_s22 }
   0xb   :  { %1206 = vmatprep.subr.mxu0 %v1120_v54 }
   0xc   :  { %p1287_p3 = por %p1286_p2, %p1285_p1 }
   0xe   :  { %p1288_p4 = pnand %p1287_p3, %p1281_p0 }
  0xd8   :  { %v1379_v7 = vpop.f32.mrb[0].mxu0 }
  0xd9   :  { %v1381_v8 = vpop.f32.mrb[1].mxu0 }
  0xda   :  { %1196 = vmatprep.mubr.msk.f32.mxu1 %vm116_vm1, %v1381_v8 }
  0xdb   :  { %1197 = vmatmul.mubr.msk.f32.vlgmr.msra.gmra.mrb[0].mxu1 %vm116_vm1, %v1379_v7 }
  0xdc   :  { %1259 = vmatpush3.bf16.xpose.msk.msra.mxu1 %vm1369_vm2, %v1254_v57 }
 0x1ae   :  { %v1198_v9 = vpop.f32.mrb[0].mxu1 }
 0x1af   :  { %v195_v10 = vpop.f32.mrb[1].mxu1  ;;  %v205_v12 = vmul.f32 2.0, %v1198_v9 }
 0x1b0   :  { %v204_v13 = vmul.f32 2.0, %v195_v10 }
 0x1b1   :  { %v213_v16 = vsub.f32 %v1115_v11, %v205_v12 }
 0x1b2   :  { %v212_v14 = vsub.f32 %v1115_v11, %v204_v13 }
 0x1b3   :  { %v218_v17 = vsel %vm214_vm3, %v213_v16, inf }
 0x1b4   :  { %v215_v15 = vsel %vm214_vm3, %v212_v14, inf }
 0x1b5   :  { %216 = vmin.xlane.f32.xlu0 %v215_v15 }
 0x1b9   :  { %219 = vmin.xlane.f32.xlu0 %v218_v17 }
 0x242   :  { %v1394_v20 = vpop.xlane.xlu0 %216 }
 0x243   :  { %vm221_vm4 = vcmp.eq.f32.partialorder %v212_v14, %v1394_v20 }
 0x244   :  { %v223_v21 = vsel %vm221_vm4, %v1392_v19, 16 }
 0x245   :  { %v225_v22 = vsel %vm214_vm3, %v223_v21, 2147483647 }
 0x246   :  { %v1399_v23 = vpop.xlane.xlu0 %219  ;;  %v227_v24 = vshra.s32 %v225_v22, 16  ;;  %v226_v30 = vand.u32 65535, %v225_v22 }
 0x247   :  { %vm222_vm5 = vcmp.eq.f32.partialorder %v213_v16, %v1399_v23 }
 0x248   :  { %v224_v25 = vsel %vm222_vm5, %v1392_v19, 16  ;;  %v229_v26 = vcvt.s32.f32 %v227_v24  ;;  %v228_v32 = vcvt.s32.f32 %v226_v30 }
 0x249   :  { %v240_v27 = vsel %vm214_vm3, %v224_v25, 2147483647 }
 0x24a   :  { %230 = vmin.xlane.f32.xlu1 %v229_v26  ;;  %v242_v28 = vshra.s32 %v240_v27, 16  ;;  %v241_v33 = vand.u32 65535, %v240_v27 }
 0x24c   :  { %v244_v29 = vcvt.s32.f32 %v242_v28  ;;  %v243_v36 = vcvt.s32.f32 %v241_v33 }
 0x24e   :  { %245 = vmin.xlane.f32.xlu1 %v244_v29 }
 0x2d7   :  { %v231_v31 = vpop.xlane.xlu1 %230 }
 0x2d8   :  { %vm232_vm6 = vcmp.eq.f32.partialorder %v229_v26, %v231_v31  ;;  %v237_v41 = vcvt.f32.s32 %v231_v31 }
 0x2d9   :  { %v233_v34 = vsel %vm232_vm6, %v228_v32, inf }
 0x2da   :  { %234 = vmin.xlane.f32.xlu0 %v233_v34  ;;  %v238_v43 = vshll.u32 %v237_v41, 16 }
 0x2db   :  { %v246_v35 = vpop.xlane.xlu1 %245 }
 0x2dc   :  { %vm247_vm7 = vcmp.eq.f32.partialorder %v244_v29, %v246_v35  ;;  %v252_v44 = vcvt.f32.s32 %v246_v35  ;;  %v1124_v35 = vld [vmem:[%s1608_s4 + $0x10] sm:$0xff] }
 0x2dd   :  { %v248_v37 = vsel %vm247_vm7, %v243_v36, inf  ;;  %v1125_v36 = vld [vmem:[%s1608_s4 + $0x18] sm:$0xff]  ;;  %vm1026_vm7 = vcmask 7168  }
 0x2de   :  { %249 = vmin.xlane.f32.xlu1 %v248_v37  ;;  %v253_v48 = vshll.u32 %v252_v44, 16  ;;  %v1260_v37 = vpack.c.bf16 %v1125_v36, %v1124_v35 }
 0x367   :  { %v235_v42 = vpop.xlane.xlu0 %234 }
 0x368   :  { %v236_v45 = vcvt.f32.s32 %v235_v42 }
 0x36a   :  { %v1410_v46 = vadd.s32 %v238_v43, %v236_v45 }
 0x36b   :  { %v250_v47 = vpop.xlane.xlu1 %249 }
 0x36c   :  { %v251_v49 = vcvt.f32.s32 %v250_v47  ;;  %vm267_vm8 = vcmp.eq.s32.totalorder %v1392_v19, %v1410_v46 }
 0x36d   :  { %v1116_v51 = vsel %vm267_vm8, 1.0, %v1304_v50 }
 0x36e   :  { %v1415_v52 = vadd.s32 %v253_v48, %v251_v49  ;;  %1203 = vmatprep.mubr.msk.f32.mxu0 %vm214_vm3, %v1116_v51 }
 0x370   :  { %vm268_vm9 = vcmp.eq.s32.totalorder %v1392_v19, %v1415_v52 }
 0x371   :  { %v1117_v53 = vsel %vm268_vm9, 1.0, %v1304_v50 }
 0x372   :  { %1204 = vmatmul.mubr.msk.f32.vlgmr.msra.gmra.mrb[2].mxu0 %vm214_vm3, %v1117_v53  ;;  %v1137_v53 = vld [vmem:[%s1605_s1 + $0x10] sm:$0xff] }
 0x373   :  { %1207 = vmatpush3.msra.mxu0 %v1120_v54  ;;  %v1138_v54 = vld [vmem:[%s1606_s2 + $0x20] sm:$0xff] }
 0x374   :  { %1261 = vmatprep.subr.bf16.mxu0 %v1260_v37  ;;  %v1264_v56 = vpack.c.bf16 %v1139_v55, %v1138_v54 }
 0x376   :  { %1266 = vmatprep.subr.msk.bf16.mxu1 %vm1369_vm2, %v1264_v56 }
 0x445   :  { %v1435_v58 = vpop.f32.mrb[2].mxu0 }
 0x446   :  { %v1437_v59 = vpop.f32.mrb[3].mxu0  ;;  %v355_v61 = vsub.f32 %v1357_v2, %v1435_v58 }
 0x447   :  { %v354_v60 = vsub.f32 %v1352_v1, %v1437_v59 }
 0x449   :  { %1208 = vmatprep.mubr.msk.f32.mxu0 %vm34_vm0, %v354_v60 }
 0x44a   :  { %1209 = vmatmul.mubr.msk.f32.vlgmr.msra.gmra.mrb[4].mxu0 %vm34_vm0, %v355_v61 }
 0x44b   :  { %1263 = vmatpush3.bf16.msra.mxu0 %v1260_v37  ;;  %v258_v37 = vmul.f32 %v1379_v7, %v1379_v7 }
 0x44c   :  { %1225 = vmatprep.subr.mxu0 %v1137_v53 }
 0x51d   :  { %v1445_v62 = vpop.f32.mrb[4].mxu0 }
 0x51e   :  { %v1447_v63 = vpop.f32.mrb[5].mxu0 }
 0x51f   :  { %1215 = vmatprep.mubr.msk.f32.mxu1 %vm116_vm1, %v1447_v63 }
 0x520   :  { %1216 = vmatmul.mubr.msk.f32.vlgmr.msra.gmra.mrb[2].mxu1 %vm116_vm1, %v1445_v62 }
 0x521   :  { %1269 = vmatpush3.bf16.xpose.msk.msra.mxu1 %vm1369_vm2, %v1264_v56 }
 0x5f3   :  { %v1217_v0 = vpop.f32.mrb[2].mxu1 }
 0x5f4   :  { %v535_v4 = vmul.f32 2.0, %v1217_v0  ;;  %v525_v6 = vpop.f32.mrb[3].mxu1 }
 0x5f5   :  { %v534_v9 = vmul.f32 2.0, %v525_v6 }
 0x5f6   :  { %v543_v10 = vsub.f32 %v1132_v3, %v535_v4 }
 0x5f7   :  { %v542_v11 = vsub.f32 %v1132_v3, %v534_v9 }
 0x5f8   :  { %v547_v12 = vsel %vm214_vm3, %v543_v10, inf }
 0x5f9   :  { %548 = vmin.xlane.f32.xlu1 %v547_v12  ;;  %v544_v13 = vsel %vm214_vm3, %v542_v11, inf }
 0x5fa   :  { %545 = vmin.xlane.f32.xlu0 %v544_v13 }
 0x686   :  { %v1458_v14 = vpop.xlane.xlu1 %548 }
 0x687   :  { %vm551_vm10 = vcmp.eq.f32.partialorder %v543_v10, %v1458_v14  ;;  %v1461_v15 = vpop.xlane.xlu0 %545 }
 0x688   :  { %v553_v16 = vsel %vm551_vm10, %v1392_v19, 16  ;;  %vm550_vm11 = vcmp.eq.f32.partialorder %v542_v11, %v1461_v15 }
 0x689   :  { %v552_v17 = vsel %vm550_vm11, %v1392_v19, 16  ;;  %v569_v18 = vsel %vm214_vm3, %v553_v16, 2147483647 }
 0x68a   :  { %v571_v21 = vshra.s32 %v569_v18, 16  ;;  %v554_v22 = vsel %vm214_vm3, %v552_v17, 2147483647  ;;  %v570_v27 = vand.u32 65535, %v569_v18 }
 0x68b   :  { %v556_v24 = vshra.s32 %v554_v22, 16  ;;  %v555_v28 = vand.u32 65535, %v554_v22 }
 0x68c   :  { %v573_v25 = vcvt.s32.f32 %v571_v21  ;;  %v572_v30 = vcvt.s32.f32 %v570_v27 }
 0x68d   :  { %v558_v26 = vcvt.s32.f32 %v556_v24  ;;  %v557_v32 = vcvt.s32.f32 %v555_v28 }
 0x68e   :  { %574 = vmin.xlane.f32.xlu1 %v573_v25 }
 0x68f   :  { %559 = vmin.xlane.f32.xlu0 %v558_v26 }
 0x71b   :  { %v575_v29 = vpop.xlane.xlu1 %574 }
 0x71c   :  { %v560_v31 = vpop.xlane.xlu0 %559  ;;  %vm576_vm12 = vcmp.eq.f32.partialorder %v573_v25, %v575_v29  ;;  %v581_v38 = vcvt.f32.s32 %v575_v29 }
 0x71d   :  { %v577_v33 = vsel %vm576_vm12, %v572_v30, inf  ;;  %vm561_vm13 = vcmp.eq.f32.partialorder %v558_v26, %v560_v31  ;;  %v566_v39 = vcvt.f32.s32 %v560_v31 }
 0x71e   :  { %578 = vmin.xlane.f32.xlu1 %v577_v33  ;;  %v562_v34 = vsel %vm561_vm13, %v557_v32, inf  ;;  %v582_v41 = vshll.u32 %v581_v38, 16 }
 0x71f   :  { %563 = vmin.xlane.f32.xlu0 %v562_v34  ;;  %v567_v44 = vshll.u32 %v566_v39, 16  ;;  %v257_v39 = vmul.f32 %v1381_v8, %v1381_v8 }
 0x7ab   :  { %v579_v40 = vpop.xlane.xlu1 %578 }
 0x7ac   :  { %v580_v42 = vcvt.f32.s32 %v579_v40  ;;  %v564_v43 = vpop.xlane.xlu0 %563 }
 0x7ad   :  { %v565_v45 = vcvt.f32.s32 %v564_v43  ;;  %v586_v43 = vmul.f32 %v1447_v63, %v1447_v63  ;;  %v1141_v63 = vld [vmem:[%s1608_s4 + $0x20] sm:$0xff] }
 0x7ae   :  { %v1474_v47 = vadd.s32 %v582_v41, %v580_v42  ;;  %v587_v41 = vmul.f32 %v1445_v62, %v1445_v62  ;;  %v262_v42 = vsel %vm116_vm1, %v258_v37, 0.0 }
 0x7af   :  { %v1476_v48 = vadd.s32 %v567_v44, %v565_v45  ;;  %v259_v44 = vsel %vm116_vm1, %v257_v39, 0.0  ;;  %v588_v8 = vsel %vm116_vm1, %v586_v43, 0.0 }
 0x7b0   :  { %vm597_vm14 = vcmp.eq.s32.totalorder %v1392_v19, %v1474_v47  ;;  %v591_v45 = vsel %vm116_vm1, %v587_v41, 0.0 }
 0x7b1   :  { %vm596_vm15 = vcmp.eq.s32.totalorder %v1392_v19, %v1476_v48  ;;  %v1134_v51 = vsel %vm597_vm14, 1.0, %v1304_v50 }
 0x7b2   :  { %v1133_v49 = vsel %vm596_vm15, 1.0, %v1304_v50 }
 0x7b3   :  { %1222 = vmatprep.mubr.msk.f32.mxu0 %vm214_vm3, %v1133_v49 }
 0x7b4   :  { %1223 = vmatmul.mubr.msk.f32.vlgmr.msra.gmra.mrb[6].mxu0 %vm214_vm3, %v1134_v51 }
 0x7b5   :  { %1226 = vmatpush3.msra.mxu0 %v1137_v53  ;;  %v1142_v53 = vld [vmem:[%s1608_s4 + $0x28] sm:$0xff] }
 0x7b6   :  { %v1270_v54 = vpack.c.bf16 %v1142_v53, %v1141_v63 }
 0x7b8   :  { %1271 = vmatprep.subr.bf16.mxu0 %v1270_v54 }
 0x887   :  { %v1224_v57 = vpop.f32.mrb[6].mxu0 }
 0x888   :  { %v1500_v60 = vadd.f32 %v1224_v57, %v1435_v58  ;;  %v674_v61 = vpop.f32.mrb[7].mxu0 }
 0x889   :  { %v1503_v0 = vadd.f32 %v674_v61, %v1437_v59  ;;  %v1149_v59 = vld [vmem:[%s1607_s3 + $0x2] ss:$0 sm:$0xff]  ;;  %v686_v61 = vmul.u32 16, %v1474_v47 }
 0x88a   :  { %v690_v4 = vsub.f32 %v1357_v2, %v1500_v60 }
 0x88b   :  { %v689_v3 = vsub.f32 %v1352_v1, %v1503_v0 }
 0x88d   :  { %1227 = vmatprep.mubr.msk.f32.mxu0 %vm34_vm0, %v689_v3 }
 0x88e   :  { %1228 = vmatmul.mubr.msk.f32.vlgmr.msra.gmra.mrb[8].mxu0 %vm34_vm0, %v690_v4 }
 0x88f   :  { %1273 = vmatpush3.bf16.msra.mxu0 %v1270_v54 }
 0x961   :  { %v1229_v5 = vpop.f32.mrb[8].mxu0 }
 0x962   :  { %v773_v6 = vpop.f32.mrb[9].mxu0  ;;  %v922_v7 = vmul.f32 %v1229_v5, %v1229_v5 }
 0x963   :  { %1234 = vmatprep.mubr.msk.f32.mxu1 %vm116_vm1, %v773_v6  ;;  %v921_v49 = vmul.f32 %v773_v6, %v773_v6  ;;  %v685_v6 = vmul.u32 16, %v1476_v48 }
 0x964   :  { %1235 = vmatmul.mubr.msk.f32.vlgmr.msra.gmra.mrb[4].mxu1 %vm116_vm1, %v1229_v5  ;;  %v926_v51 = vsel %vm116_vm1, %v922_v7, 0.0 }
 0x965   :  { %v923_v62 = vsel %vm116_vm1, %v921_v49, 0.0 }
 0xa37   :  { %v1236_v58 = vpop.f32.mrb[4].mxu1 }
 0xa38   :  { %v870_v9 = vmul.f32 2.0, %v1236_v58  ;;  %v860_v10 = vpop.f32.mrb[5].mxu1 }
 0xa39   :  { %v869_v11 = vmul.f32 2.0, %v860_v10 }
 0xa3a   :  { %v878_v12 = vsub.f32 %v1149_v59, %v870_v9 }
 0xa3b   :  { %v877_v13 = vsub.f32 %v1149_v59, %v869_v11  ;;  %v688_v11 = vadd.s32 %v686_v61, %v1415_v52 }
 0xa3c   :  { %v882_v16 = vsel %vm214_vm3, %v878_v12, inf }
 0xa3d   :  { %883 = vmin.xlane.f32.xlu1 %v882_v16  ;;  %v879_v17 = vsel %vm214_vm3, %v877_v13, inf }
 0xa3e   :  { %880 = vmin.xlane.f32.xlu0 %v879_v17 }
 0xaca   :  { %v1518_v18 = vpop.xlane.xlu1 %883 }
 0xacb   :  { %vm886_vm2 = vcmp.eq.f32.partialorder %v878_v12, %v1518_v18  ;;  %v1521_v21 = vpop.xlane.xlu0 %880 }
 0xacc   :  { %v888_v22 = vsel %vm886_vm2, %v1392_v19, 16  ;;  %vm885_vm4 = vcmp.eq.f32.partialorder %v877_v13, %v1521_v21  ;;  %v687_v13 = vadd.s32 %v685_v6, %v1410_v46 }
 0xacd   :  { %v887_v24 = vsel %vm885_vm4, %v1392_v19, 16  ;;  %v904_v25 = vsel %vm214_vm3, %v888_v22, 2147483647 }
 0xace   :  { %v906_v26 = vshra.s32 %v904_v25, 16  ;;  %v889_v27 = vsel %vm214_vm3, %v887_v24, 2147483647  ;;  %v905_v31 = vand.u32 65535, %v904_v25 }
 0xacf   :  { %v891_v28 = vshra.s32 %v889_v27, 16  ;;  %v890_v32 = vand.u32 65535, %v889_v27 }
 0xad0   :  { %v908_v29 = vcvt.s32.f32 %v906_v26  ;;  %v907_v34 = vcvt.s32.f32 %v905_v31 }
 0xad1   :  { %v893_v30 = vcvt.s32.f32 %v891_v28  ;;  %v892_v36 = vcvt.s32.f32 %v890_v32 }
 0xad2   :  { %909 = vmin.xlane.f32.xlu1 %v908_v29 }
 0xad3   :  { %894 = vmin.xlane.f32.xlu0 %v893_v30 }
 0xb5f   :  { %v910_v33 = vpop.xlane.xlu1 %909 }
 0xb60   :  { %v895_v35 = vpop.xlane.xlu0 %894  ;;  %vm911_vm5 = vcmp.eq.f32.partialorder %v908_v29, %v910_v33  ;;  %v916_v55 = vcvt.f32.s32 %v910_v33 }
 0xb61   :  { %v912_v38 = vsel %vm911_vm5, %v907_v34, inf  ;;  %vm896_vm6 = vcmp.eq.f32.partialorder %v893_v30, %v895_v35  ;;  %v901_v56 = vcvt.f32.s32 %v895_v35 }
 0xb62   :  { %913 = vmin.xlane.f32.xlu1 %v912_v38  ;;  %v897_v40 = vsel %vm896_vm6, %v892_v36, inf  ;;  %v917_v3 = vshll.u32 %v916_v55, 16 }
 0xb63   :  { %898 = vmin.xlane.f32.xlu0 %v897_v40  ;;  %v902_v58 = vshll.u32 %v901_v56, 16 }
 0xb66   :  { %263 = vadd.xlane.f32.xlu1 %v262_v42 }
 0xb67   :  { %260 = vadd.xlane.f32.xlu0 %v259_v44 }
 0xb6a   :  { %592 = vadd.xlane.f32.xlu1 %v591_v45 }
 0xb6b   :  { %589 = vadd.xlane.f32.xlu0 %v588_v8 }
 0xb6e   :  { %927 = vadd.xlane.f32.xlu1 %v926_v51 }
 0xb6f   :  { %924 = vadd.xlane.f32.xlu0 %v923_v62 }
 0xbef   :  { %v914_v57 = vpop.xlane.xlu1 %913 }
 0xbf0   :  { %v915_v4 = vcvt.f32.s32 %v914_v57  ;;  %v899_v5 = vpop.xlane.xlu0 %898 }
 0xbf1   :  { %v900_v59 = vcvt.f32.s32 %v899_v5 }
 0xbf2   :  { %v918_v9 = vadd.s32 %v917_v3, %v915_v4 }
 0xbf3   :  { %v903_v10 = vadd.s32 %v902_v58, %v900_v59  ;;  %v264_v46 = vpop.xlane.xlu1 %263 }
 0xbf4   :  { %vm932_vm1 = vcmp.eq.s32.totalorder %v1392_v19, %v918_v9  ;;  %v1021_v12 = vmul.u32 256, %v918_v9  ;;  %v261_v52 = vpop.xlane.xlu0 %260  ;;  %v266_v24 = vadd.f32 %v264_v46, %v1399_v23 }
 0xbf5   :  { %v1020_v16 = vmul.u32 256, %v903_v10  ;;  %vm931_vm8 = vcmp.eq.s32.totalorder %v1392_v19, %v903_v10  ;;  %v1151_v48 = vsel %vm932_vm1, 1.0, %v1304_v50 }
 0xbf6   :  { %v1023_v47 = vadd.s32 %v1021_v12, %v688_v11  ;;  %v1150_v17 = vsel %vm931_vm8, 1.0, %v1304_v50  ;;  %v265_v50 = vadd.f32 %v261_v52, %v1394_v20  ;;  %v585_v25 = vadd.f32 %v1458_v14, %v266_v24 }
 0xbf7   :  { %v1022_v22 = vadd.s32 %v1020_v16, %v687_v13  ;;  %1241 = vmatprep.mubr.msk.f32.mxu0 %vm214_vm3, %v1150_v17  ;;  %v593_v27 = vpop.xlane.xlu1 %592 }
 0xbf8   :  { %1028 = vst.msk [vmem:[%s1610_s6 + $0x8] sm:$0xff] %vm1026_vm7, %v1023_v47  ;;  %1242 = vmatmul.mubr.msk.f32.vlgmr.msra.gmra.mrb[10].mxu0 %vm214_vm3, %v1151_v48  ;;  %v584_v26 = vadd.f32 %v1461_v15, %v265_v50  ;;  %v590_v28 = vpop.xlane.xlu0 %589  ;;  %v595_v29 = vadd.f32 %v593_v27, %v585_v25  ;;  %vm1080_vm3 = vcmp.eq.s32.totalorder %v1392_v19, 0 }
 0xbf9   :  { %1027 = vst.msk [vmem:[%s1610_s6] sm:$0xff] %vm1026_vm7, %v1022_v22 }
 0xbfa   :  { %v594_v30 = vadd.f32 %v590_v28, %v584_v26  ;;  %v920_v31 = vadd.f32 %v1518_v18, %v595_v29 }
 0xbfb   :  { %v928_v32 = vpop.xlane.xlu1 %927 }
 0xbfc   :  { %v919_v33 = vadd.f32 %v1521_v21, %v594_v30  ;;  %v925_v35 = vpop.xlane.xlu0 %924  ;;  %v930_v15 = vadd.f32 %v928_v32, %v920_v31 }
 0xbfe   :  { %v929_v37 = vadd.f32 %v925_v35, %v919_v33 }
 0xc00   :  { %v1044_v39 = vsel %vm1026_vm7, %v929_v37, 0.0 }
 0xccb   :  { %v1243_v34 = vpop.f32.mrb[10].mxu0 }
 0xccc   :  { %v1019_v36 = vadd.f32 %v1243_v34, %v1500_v60  ;;  %v1009_v23 = vpop.f32.mrb[11].mxu0 }
 0xccd   :  { %v1018_v20 = vadd.f32 %v1009_v23, %v1503_v0 }
 0xcce   :  { %1025 = vst.msk [vmem:[%s1609_s5 + $0x8] sm:$0xff] %vm34_vm0, %v1019_v36  ;;  %v1057_v14 = vsub.f32 %v1019_v36, %v1357_v2  ;;  %v1045_v2 = vsel %vm1026_vm7, %v930_v15, 0.0 }
 0xccf   :  { %1024 = vst.msk [vmem:[%s1609_s5] sm:$0xff] %vm34_vm0, %v1018_v20  ;;  %v1056_v18 = vsub.f32 %v1018_v20, %v1352_v1  ;;  %v1046_v40 = vadd.f32 %v1045_v2, %v1044_v39 }
 0xcd0   :  { %v1059_v60 = vmul.f32 %v1057_v14, %v1057_v14 }
 0xcd1   :  { %v1058_v21 = vmul.f32 %v1056_v18, %v1056_v18 }
 0xcd2   :  { %v1063_v0 = vsel %vm34_vm0, %v1059_v60, 0.0 }
 0xcd3   :  { %1064 = vadd.xlane.f32.xlu1 %v1063_v0  ;;  %v1060_v38 = vsel %vm34_vm0, %v1058_v21, 0.0  ;;  %vm1081_vm0 = vcmp.eq.s32.totalorder %v1392_v19, 1 }
 0xcd4   :  { %1061 = vadd.xlane.f32.xlu0 %v1060_v38 }
 0xcd8   :  { %1047 = vadd.xlane.f32.xlu0 %v1046_v40 }
 0xd60   :  { %v1065_v41 = vpop.xlane.xlu1 %1064 }
 0xd61   :  { %v1069_v42 = vsel %vm1026_vm7, %v1065_v41, 0.0  ;;  %v1062_v43 = vpop.xlane.xlu0 %1061 }
 0xd62   :  { %v1068_v1 = vsel %vm1026_vm7, %v1062_v43, 0.0 }
 0xd63   :  { %v1070_v44 = vadd.f32 %v1069_v42, %v1068_v1 }
 0xd65   :  { %1071 = vadd.xlane.f32.xlu1 %v1070_v44  ;;  %v1048_v7 = vpop.xlane.xlu0 %1047 }
 0xd66   :  { %v1049_v45 = vrot.slane %v1048_v7, 4 }
 0xd68   :  { %v1050_v49 = vadd.f32 %v1049_v45, %v1048_v7 }
 0xd6a   :  { %v1051_v8 = vrot.slane %v1050_v49, 2 }
 0xd6c   :  { %v1052_v51 = vadd.f32 %v1051_v8, %v1050_v49 }
 0xd6e   :  { %v1053_v62 = vrot.slane %v1052_v51, 1 }
 0xd70   :  { %v1054_v63 = vadd.f32 %v1053_v62, %v1052_v51 }
 0xd72   :  { %1274 = vpush %v1054_v63 }
 0xda3   :  { %s1275_s5 = spop %1274 }
 0xda4   :  { %v1084_v5 = vstv %s1275_s5 }
 0xdf2   :  { %v1072_v53 = vpop.xlane.xlu1 %1071 }
 0xdf3   :  { %v1073_v54 = vrot.slane %v1072_v53, 4 }
 0xdf5   :  { %v1074_v55 = vadd.f32 %v1073_v54, %v1072_v53 }
 0xdf7   :  { %v1075_v56 = vrot.slane %v1074_v55, 2 }
 0xdf9   :  { %v1076_v57 = vadd.f32 %v1075_v56, %v1074_v55 }
 0xdfb   :  { %v1077_v61 = vrot.slane %v1076_v57, 1 }
 0xdfd   :  { %v1078_v3 = vadd.f32 %v1077_v61, %v1076_v57 }
 0xdff   :  { %1276 = vpush %v1078_v3 }
 0xe30   :  { %s1277_s21 = spop %1276 }
 0xe31   :  { %v1082_v4 = vstv %s1277_s21 }
 0xe32   :  { %v1083_v6 = vsel %vm1081_vm0, %v1082_v4, 0.0 }
 0xe33   :  { %v1085_v58 = vsel %vm1080_vm3, %v1084_v5, %v1083_v6 }
 0xe34   :  { %1086 = vst [vmem:[#allocation2] sm:$0x1] %v1085_v58 }
 0xe35   :  { %1291 = shalt.err (!%p1288_p4)
}
 0xe36   :  { %s1292_s26 = scalar_lea.hbm %s1611_s7, 16 }
 0xe37   :  { %p1293_p5 = scmp.ne.s32.totalorder %s1611_s7, %s1292_s26  ;;  %p1296_p6 = scmp.lt.u32.totalorder %s1292_s26, %s1611_s7 }
 0xe39   :  { %p1298_p7 = pnand %p1296_p6, %p1293_p5 }
 0xe3b   :  { %1301 = shalt.err (!%p1298_p7)
}
 0xe3c   :  { %1100 = dma.vmem_to_hbm [thread:$0]  %s1098_s20, 16, %s1611_s7, [#allocation3]  }
 0xe3d   :  { %1302 = dma.done.wait [#allocation3], 16  }
 0xe3e   :  { %1303 = vsyncadd [#allocation3], 4294967280 }
 0xe3f   :  { %1108 = vsyncpa [#allocation3], 1 }

// kernel: tpu_custom_call.1
= control target key start
LH: loop header
LB: loop body
LE: loop exit
PB: predicated region body
PF: predicated region fallthrough
CT: control target
= control target key end

     0   :  { %vm34_vm0 = vcmask 64512   ;;  %vm116_vm1 = vcmask 261120   ;;  %s1604_s0 = inlined_call_operand.vmem [shape: f32[16,8], index: 0, kind: input, shape index: {}]   ;;  %s1605_s1 = inlined_call_operand.vmem [shape: f32[3,8,32], index: 1, kind: input, shape index: {}]   ;;  %s1606_s2 = inlined_call_operand.vmem [shape: f32[3,16,32], index: 2, kind: input, shape index: {}]   ;;  %s1607_s3 = inlined_call_operand.vmem [shape: f32[3,1,16], index: 3, kind: input, shape index: {}]   ;;  %s1608_s4 = inlined_call_operand.vmem [shape: f32[3,16,8], index: 4, kind: input, shape index: {}]   ;;  %s1609_s5 = inlined_call_operand.vmem [shape: f32[16,8], index: 5, kind: output, shape index: {0}]   ;;  %s1610_s6 = inlined_call_operand.vmem [shape: s32[16,1], index: 6, kind: output, shape index: {1}]   ;;  %s1611_s7 = inlined_call_operand.hbm [shape: f32[1,1,128], index: 7, kind: output, shape index: {2}]  }
   0x1   :  { %v28_v0 = vld [vmem:[%s1605_s1] sm:$0xff]  ;;  %v1357_v2 = vld [vmem:[%s1604_s0 + $0x8] sm:$0xff]  ;;  %vm1369_vm2 = vmpackc.low %vm116_vm1, %vm116_vm1 }
   0x2   :  { %v1352_v1 = vld [vmem:[%s1604_s0] sm:$0xff]  ;;  %1187 = vmatprep.subr.mxu0 %v28_v0  ;;  %v30_v4 = vld [vmem:[%s1606_s2 + $0x8] sm:$0xff] }
   0x3   :  { %1189 = vmatprep.mubr.msk.f32.mxu0 %vm34_vm0, %v1352_v1  ;;  %v29_v3 = vld [vmem:[%s1606_s2] sm:$0xff]  ;;  %1188 = vmatpush3.msra.mxu0 %v28_v0 }
   0x4   :  { %v1244_v6 = vpack.c.bf16 %v30_v4, %v29_v3 }
   0x5   :  { %13 = vsyncpa [#allocation3], 0  ;;  %1190 = vmatmul.mubr.msk.f32.vlgmr.msra.gmra.mrb[0].mxu0 %vm34_vm0, %v1357_v2  ;;  %v1115_v11 = vld [vmem:[%s1607_s3] ss:$0 sm:$0xff]  ;;  %vm214_vm3 = vcmask 130048   ;;  %v26_v18 = vlaneseq  ;;  %v33_v39 = vld [vmem:[%s1608_s4 + $0x8] sm:$0xff] }
   0x6   :  { %1246 = vmatprep.subr.msk.bf16.mxu1 %vm1369_vm2, %v1244_v6  ;;  %v32_v38 = vld [vmem:[%s1608_s4] sm:$0xff]  ;;  %v1304_v50 = vmov 0.0   ;;  %v1120_v54 = vld [vmem:[%s1605_s1 + $0x8] sm:$0xff]  ;;  %v1121_v55 = vld [vmem:[%s1606_s2 + $0x10] sm:$0xff]  ;;  %s1305_s19 = smov [#allocation2]  }
   0x7   :  { %1249 = vmatpush3.bf16.xpose.msk.msra.mxu1 %vm1369_vm2, %v1244_v6  ;;  %v1392_v19 = vand.u32 127, %v26_v18  ;;  %v1250_v40 = vpack.c.bf16 %v33_v39, %v32_v38  ;;  %v1122_v56 = vld [vmem:[%s1606_s2 + $0x18] sm:$0xff]  ;;  %v1132_v3 = vld [vmem:[%s1607_s3 + $0x1] ss:$0 sm:$0xff]  ;;  %s1097_s20 = sshll.u32 %s1305_s19, 4  ;;  %s1098_s20 = int_to_ptr.vmem [resolvable:$true] %s1097_s20 }
   0x8   :  { %v1254_v57 = vpack.c.bf16 %v1122_v56, %v1121_v55  ;;  %v1139_v55 = vld [vmem:[%s1606_s2 + $0x28] sm:$0xff]  ;;  %s1280_s22 = scalar_lea.vmem %s1098_s20, 16  ;;  %s1284_s23 = scalar_lea.vmem %s1098_s20, 32 }
   0x9   :  { %1251 = vmatprep.subr.bf16.mxu0 %v1250_v40  ;;  %p1281_p0 = scmp.ne.s32.totalorder %s1098_s20, %s1280_s22  ;;  %p1285_p1 = scmp.lt.s32.totalorder %s1098_s20, %s1098_s20 }
   0xa   :  { %1253 = vmatpush3.bf16.msra.mxu0 %v1250_v40  ;;  %1256 = vmatprep.subr.msk.bf16.mxu1 %vm1369_vm2, %v1254_v57  ;;  %p1286_p2 = scmp.lt.s32.totalorder %s1284_s23, %s1280_s22 }
   0xb   :  { %1206 = vmatprep.subr.mxu0 %v1120_v54 }
   0xc   :  { %p1287_p3 = por %p1286_p2, %p1285_p1 }
   0xe   :  { %p1288_p4 = pnand %p1287_p3, %p1281_p0 }
  0xd8   :  { %v1379_v7 = vpop.f32.mrb[0].mxu0 }
  0xd9   :  { %v1381_v8 = vpop.f32.mrb[1].mxu0 }
  0xda   :  { %1196 = vmatprep.mubr.msk.f32.mxu1 %vm116_vm1, %v1381_v8 }
  0xdb   :  { %1197 = vmatmul.mubr.msk.f32.vlgmr.msra.gmra.mrb[0].mxu1 %vm116_vm1, %v1379_v7 }
  0xdc   :  { %1259 = vmatpush3.bf16.xpose.msk.msra.mxu1 %vm1369_vm2, %v1254_v57 }
 0x1ae   :  { %v1198_v9 = vpop.f32.mrb[0].mxu1 }
 0x1af   :  { %v195_v10 = vpop.f32.mrb[1].mxu1  ;;  %v205_v12 = vmul.f32 2.0, %v1198_v9 }
 0x1b0   :  { %v204_v13 = vmul.f32 2.0, %v195_v10 }
 0x1b1   :  { %v213_v16 = vsub.f32 %v1115_v11, %v205_v12 }
 0x1b2   :  { %v212_v14 = vsub.f32 %v1115_v11, %v204_v13 }
 0x1b3   :  { %v218_v17 = vsel %vm214_vm3, %v213_v16, inf }
 0x1b4   :  { %v215_v15 = vsel %vm214_vm3, %v212_v14, inf }
 0x1b5   :  { %216 = vmin.xlane.f32.xlu0 %v215_v15 }
 0x1b9   :  { %219 = vmin.xlane.f32.xlu0 %v218_v17 }
 0x242   :  { %v1394_v20 = vpop.xlane.xlu0 %216 }
 0x243   :  { %vm221_vm4 = vcmp.eq.f32.partialorder %v212_v14, %v1394_v20 }
 0x244   :  { %v223_v21 = vsel %vm221_vm4, %v1392_v19, 16 }
 0x245   :  { %v225_v22 = vsel %vm214_vm3, %v223_v21, 2147483647 }
 0x246   :  { %v1399_v23 = vpop.xlane.xlu0 %219  ;;  %v227_v24 = vshra.s32 %v225_v22, 16  ;;  %v226_v30 = vand.u32 65535, %v225_v22 }
 0x247   :  { %vm222_vm5 = vcmp.eq.f32.partialorder %v213_v16, %v1399_v23 }
 0x248   :  { %v224_v25 = vsel %vm222_vm5, %v1392_v19, 16  ;;  %v229_v26 = vcvt.s32.f32 %v227_v24  ;;  %v228_v32 = vcvt.s32.f32 %v226_v30 }
 0x249   :  { %v240_v27 = vsel %vm214_vm3, %v224_v25, 2147483647 }
 0x24a   :  { %230 = vmin.xlane.f32.xlu1 %v229_v26  ;;  %v242_v28 = vshra.s32 %v240_v27, 16  ;;  %v241_v33 = vand.u32 65535, %v240_v27 }
 0x24c   :  { %v244_v29 = vcvt.s32.f32 %v242_v28  ;;  %v243_v36 = vcvt.s32.f32 %v241_v33 }
 0x24e   :  { %245 = vmin.xlane.f32.xlu1 %v244_v29 }
 0x2d7   :  { %v231_v31 = vpop.xlane.xlu1 %230 }
 0x2d8   :  { %vm232_vm6 = vcmp.eq.f32.partialorder %v229_v26, %v231_v31  ;;  %v237_v41 = vcvt.f32.s32 %v231_v31 }
 0x2d9   :  { %v233_v34 = vsel %vm232_vm6, %v228_v32, inf }
 0x2da   :  { %234 = vmin.xlane.f32.xlu0 %v233_v34  ;;  %v238_v43 = vshll.u32 %v237_v41, 16 }
 0x2db   :  { %v246_v35 = vpop.xlane.xlu1 %245 }
 0x2dc   :  { %vm247_vm7 = vcmp.eq.f32.partialorder %v244_v29, %v246_v35  ;;  %v252_v44 = vcvt.f32.s32 %v246_v35  ;;  %v1124_v35 = vld [vmem:[%s1608_s4 + $0x10] sm:$0xff] }
 0x2dd   :  { %v248_v37 = vsel %vm247_vm7, %v243_v36, inf  ;;  %v1125_v36 = vld [vmem:[%s1608_s4 + $0x18] sm:$0xff]  ;;  %vm1026_vm7 = vcmask 7168  }
 0x2de   :  { %249 = vmin.xlane.f32.xlu1 %v248_v37  ;;  %v253_v48 = vshll.u32 %v252_v44, 16  ;;  %v1260_v37 = vpack.c.bf16 %v1125_v36, %v1124_v35 }
 0x367   :  { %v235_v42 = vpop.xlane.xlu0 %234 }
 0x368   :  { %v236_v45 = vcvt.f32.s32 %v235_v42 }
 0x36a   :  { %v1410_v46 = vadd.s32 %v238_v43, %v236_v45 }
 0x36b   :  { %v250_v47 = vpop.xlane.xlu1 %249 }
 0x36c   :  { %v251_v49 = vcvt.f32.s32 %v250_v47  ;;  %vm267_vm8 = vcmp.eq.s32.totalorder %v1392_v19, %v1410_v46 }
 0x36d   :  { %v1116_v51 = vsel %vm267_vm8, 1.0, %v1304_v50 }
 0x36e   :  { %v1415_v52 = vadd.s32 %v253_v48, %v251_v49  ;;  %1203 = vmatprep.mubr.msk.f32.mxu0 %vm214_vm3, %v1116_v51 }
 0x370   :  { %vm268_vm9 = vcmp.eq.s32.totalorder %v1392_v19, %v1415_v52 }
 0x371   :  { %v1117_v53 = vsel %vm268_vm9, 1.0, %v1304_v50 }
 0x372   :  { %1204 = vmatmul.mubr.msk.f32.vlgmr.msra.gmra.mrb[2].mxu0 %vm214_vm3, %v1117_v53  ;;  %v1137_v53 = vld [vmem:[%s1605_s1 + $0x10] sm:$0xff] }
 0x373   :  { %1207 = vmatpush3.msra.mxu0 %v1120_v54  ;;  %v1138_v54 = vld [vmem:[%s1606_s2 + $0x20] sm:$0xff] }
 0x374   :  { %1261 = vmatprep.subr.bf16.mxu0 %v1260_v37  ;;  %v1264_v56 = vpack.c.bf16 %v1139_v55, %v1138_v54 }
 0x376   :  { %1266 = vmatprep.subr.msk.bf16.mxu1 %vm1369_vm2, %v1264_v56 }
 0x445   :  { %v1435_v58 = vpop.f32.mrb[2].mxu0 }
 0x446   :  { %v1437_v59 = vpop.f32.mrb[3].mxu0  ;;  %v355_v61 = vsub.f32 %v1357_v2, %v1435_v58 }
 0x447   :  { %v354_v60 = vsub.f32 %v1352_v1, %v1437_v59 }
 0x449   :  { %1208 = vmatprep.mubr.msk.f32.mxu0 %vm34_vm0, %v354_v60 }
 0x44a   :  { %1209 = vmatmul.mubr.msk.f32.vlgmr.msra.gmra.mrb[4].mxu0 %vm34_vm0, %v355_v61 }
 0x44b   :  { %1263 = vmatpush3.bf16.msra.mxu0 %v1260_v37  ;;  %v258_v37 = vmul.f32 %v1379_v7, %v1379_v7 }
 0x44c   :  { %1225 = vmatprep.subr.mxu0 %v1137_v53 }
 0x51d   :  { %v1445_v62 = vpop.f32.mrb[4].mxu0 }
 0x51e   :  { %v1447_v63 = vpop.f32.mrb[5].mxu0 }
 0x51f   :  { %1215 = vmatprep.mubr.msk.f32.mxu1 %vm116_vm1, %v1447_v63 }
 0x520   :  { %1216 = vmatmul.mubr.msk.f32.vlgmr.msra.gmra.mrb[2].mxu1 %vm116_vm1, %v1445_v62 }
 0x521   :  { %1269 = vmatpush3.bf16.xpose.msk.msra.mxu1 %vm1369_vm2, %v1264_v56 }
 0x5f3   :  { %v1217_v0 = vpop.f32.mrb[2].mxu1 }
 0x5f4   :  { %v535_v4 = vmul.f32 2.0, %v1217_v0  ;;  %v525_v6 = vpop.f32.mrb[3].mxu1 }
 0x5f5   :  { %v534_v9 = vmul.f32 2.0, %v525_v6 }
 0x5f6   :  { %v543_v10 = vsub.f32 %v1132_v3, %v535_v4 }
 0x5f7   :  { %v542_v11 = vsub.f32 %v1132_v3, %v534_v9 }
 0x5f8   :  { %v547_v12 = vsel %vm214_vm3, %v543_v10, inf }
 0x5f9   :  { %548 = vmin.xlane.f32.xlu1 %v547_v12  ;;  %v544_v13 = vsel %vm214_vm3, %v542_v11, inf }
 0x5fa   :  { %545 = vmin.xlane.f32.xlu0 %v544_v13 }
 0x686   :  { %v1458_v14 = vpop.xlane.xlu1 %548 }
 0x687   :  { %vm551_vm10 = vcmp.eq.f32.partialorder %v543_v10, %v1458_v14  ;;  %v1461_v15 = vpop.xlane.xlu0 %545 }
 0x688   :  { %v553_v16 = vsel %vm551_vm10, %v1392_v19, 16  ;;  %vm550_vm11 = vcmp.eq.f32.partialorder %v542_v11, %v1461_v15 }
 0x689   :  { %v552_v17 = vsel %vm550_vm11, %v1392_v19, 16  ;;  %v569_v18 = vsel %vm214_vm3, %v553_v16, 2147483647 }
 0x68a   :  { %v571_v21 = vshra.s32 %v569_v18, 16  ;;  %v554_v22 = vsel %vm214_vm3, %v552_v17, 2147483647  ;;  %v570_v27 = vand.u32 65535, %v569_v18 }
 0x68b   :  { %v556_v24 = vshra.s32 %v554_v22, 16  ;;  %v555_v28 = vand.u32 65535, %v554_v22 }
 0x68c   :  { %v573_v25 = vcvt.s32.f32 %v571_v21  ;;  %v572_v30 = vcvt.s32.f32 %v570_v27 }
 0x68d   :  { %v558_v26 = vcvt.s32.f32 %v556_v24  ;;  %v557_v32 = vcvt.s32.f32 %v555_v28 }
 0x68e   :  { %574 = vmin.xlane.f32.xlu1 %v573_v25 }
 0x68f   :  { %559 = vmin.xlane.f32.xlu0 %v558_v26 }
 0x71b   :  { %v575_v29 = vpop.xlane.xlu1 %574 }
 0x71c   :  { %v560_v31 = vpop.xlane.xlu0 %559  ;;  %vm576_vm12 = vcmp.eq.f32.partialorder %v573_v25, %v575_v29  ;;  %v581_v38 = vcvt.f32.s32 %v575_v29 }
 0x71d   :  { %v577_v33 = vsel %vm576_vm12, %v572_v30, inf  ;;  %vm561_vm13 = vcmp.eq.f32.partialorder %v558_v26, %v560_v31  ;;  %v566_v39 = vcvt.f32.s32 %v560_v31 }
 0x71e   :  { %578 = vmin.xlane.f32.xlu1 %v577_v33  ;;  %v562_v34 = vsel %vm561_vm13, %v557_v32, inf  ;;  %v582_v41 = vshll.u32 %v581_v38, 16 }
 0x71f   :  { %563 = vmin.xlane.f32.xlu0 %v562_v34  ;;  %v567_v44 = vshll.u32 %v566_v39, 16  ;;  %v257_v39 = vmul.f32 %v1381_v8, %v1381_v8 }
 0x7ab   :  { %v579_v40 = vpop.xlane.xlu1 %578 }
 0x7ac   :  { %v580_v42 = vcvt.f32.s32 %v579_v40  ;;  %v564_v43 = vpop.xlane.xlu0 %563 }
 0x7ad   :  { %v565_v45 = vcvt.f32.s32 %v564_v43  ;;  %v586_v43 = vmul.f32 %v1447_v63, %v1447_v63  ;;  %v1141_v63 = vld [vmem:[%s1608_s4 + $0x20] sm:$0xff] }
 0x7ae   :  { %v1474_v47 = vadd.s32 %v582_v41, %v580_v42  ;;  %v587_v41 = vmul.f32 %v1445_v62, %v1445_v62  ;;  %v262_v42 = vsel %vm116_vm1, %v258_v37, 0.0 }
 0x7af   :  { %v1476_v48 = vadd.s32 %v567_v44, %v565_v45  ;;  %v259_v44 = vsel %vm116_vm1, %v257_v39, 0.0  ;;  %v588_v8 = vsel %vm116_vm1, %v586_v43, 0.0 }
 0x7b0   :  { %vm597_vm14 = vcmp.eq.s32.totalorder %v1392_v19, %v1474_v47  ;;  %v591_v45 = vsel %vm116_vm1, %v587_v41, 0.0 }
 0x7b1   :  { %vm596_vm15 = vcmp.eq.s32.totalorder %v1392_v19, %v1476_v48  ;;  %v1134_v51 = vsel %vm597_vm14, 1.0, %v1304_v50 }
 0x7b2   :  { %v1133_v49 = vsel %vm596_vm15, 1.0, %v1304_v50 }
 0x7b3   :  { %1222 = vmatprep.mubr.msk.f32.mxu0 %vm214_vm3, %v1133_v49 }
 0x7b4   :  { %1223 = vmatmul.mubr.msk.f32.vlgmr.msra.gmra.mrb[6].mxu0 %vm214_vm3, %v1134_v51 }
 0x7b5   :  { %1226 = vmatpush3.msra.mxu0 %v1137_v53  ;;  %v1142_v53 = vld [vmem:[%s1608_s4 + $0x28] sm:$0xff] }
 0x7b6   :  { %v1270_v54 = vpack.c.bf16 %v1142_v53, %v1141_v63 }
 0x7b8   :  { %1271 = vmatprep.subr.bf16.mxu0 %v1270_v54 }
 0x887   :  { %v1224_v57 = vpop.f32.mrb[6].mxu0 }
 0x888   :  { %v1500_v60 = vadd.f32 %v1224_v57, %v1435_v58  ;;  %v674_v61 = vpop.f32.mrb[7].mxu0 }
 0x889   :  { %v1503_v0 = vadd.f32 %v674_v61, %v1437_v59  ;;  %v1149_v59 = vld [vmem:[%s1607_s3 + $0x2] ss:$0 sm:$0xff]  ;;  %v686_v61 = vmul.u32 16, %v1474_v47 }
 0x88a   :  { %v690_v4 = vsub.f32 %v1357_v2, %v1500_v60 }
 0x88b   :  { %v689_v3 = vsub.f32 %v1352_v1, %v1503_v0 }
 0x88d   :  { %1227 = vmatprep.mubr.msk.f32.mxu0 %vm34_vm0, %v689_v3 }
 0x88e   :  { %1228 = vmatmul.mubr.msk.f32.vlgmr.msra.gmra.mrb[8].mxu0 %vm34_vm0, %v690_v4 }
 0x88f   :  { %1273 = vmatpush3.bf16.msra.mxu0 %v1270_v54 }
 0x961   :  { %v1229_v5 = vpop.f32.mrb[8].mxu0 }
 0x962   :  { %v773_v6 = vpop.f32.mrb[9].mxu0  ;;  %v922_v7 = vmul.f32 %v1229_v5, %v1229_v5 }
 0x963   :  { %1234 = vmatprep.mubr.msk.f32.mxu1 %vm116_vm1, %v773_v6  ;;  %v921_v49 = vmul.f32 %v773_v6, %v773_v6  ;;  %v685_v6 = vmul.u32 16, %v1476_v48 }
 0x964   :  { %1235 = vmatmul.mubr.msk.f32.vlgmr.msra.gmra.mrb[4].mxu1 %vm116_vm1, %v1229_v5  ;;  %v926_v51 = vsel %vm116_vm1, %v922_v7, 0.0 }
 0x965   :  { %v923_v62 = vsel %vm116_vm1, %v921_v49, 0.0 }
 0xa37   :  { %v1236_v58 = vpop.f32.mrb[4].mxu1 }
 0xa38   :  { %v870_v9 = vmul.f32 2.0, %v1236_v58  ;;  %v860_v10 = vpop.f32.mrb[5].mxu1 }
 0xa39   :  { %v869_v11 = vmul.f32 2.0, %v860_v10 }
 0xa3a   :  { %v878_v12 = vsub.f32 %v1149_v59, %v870_v9 }
 0xa3b   :  { %v877_v13 = vsub.f32 %v1149_v59, %v869_v11  ;;  %v688_v11 = vadd.s32 %v686_v61, %v1415_v52 }
 0xa3c   :  { %v882_v16 = vsel %vm214_vm3, %v878_v12, inf }
 0xa3d   :  { %883 = vmin.xlane.f32.xlu1 %v882_v16  ;;  %v879_v17 = vsel %vm214_vm3, %v877_v13, inf }
 0xa3e   :  { %880 = vmin.xlane.f32.xlu0 %v879_v17 }
 0xaca   :  { %v1518_v18 = vpop.xlane.xlu1 %883 }
 0xacb   :  { %vm886_vm2 = vcmp.eq.f32.partialorder %v878_v12, %v1518_v18  ;;  %v1521_v21 = vpop.xlane.xlu0 %880 }
 0xacc   :  { %v888_v22 = vsel %vm886_vm2, %v1392_v19, 16  ;;  %vm885_vm4 = vcmp.eq.f32.partialorder %v877_v13, %v1521_v21  ;;  %v687_v13 = vadd.s32 %v685_v6, %v1410_v46 }
 0xacd   :  { %v887_v24 = vsel %vm885_vm4, %v1392_v19, 16  ;;  %v904_v25 = vsel %vm214_vm3, %v888_v22, 2147483647 }
 0xace   :  { %v906_v26 = vshra.s32 %v904_v25, 16  ;;  %v889_v27 = vsel %vm214_vm3, %v887_v24, 2147483647  ;;  %v905_v31 = vand.u32 65535, %v904_v25 }
 0xacf   :  { %v891_v28 = vshra.s32 %v889_v27, 16  ;;  %v890_v32 = vand.u32 65535, %v889_v27 }
 0xad0   :  { %v908_v29 = vcvt.s32.f32 %v906_v26  ;;  %v907_v34 = vcvt.s32.f32 %v905_v31 }
 0xad1   :  { %v893_v30 = vcvt.s32.f32 %v891_v28  ;;  %v892_v36 = vcvt.s32.f32 %v890_v32 }
 0xad2   :  { %909 = vmin.xlane.f32.xlu1 %v908_v29 }
 0xad3   :  { %894 = vmin.xlane.f32.xlu0 %v893_v30 }
 0xb5f   :  { %v910_v33 = vpop.xlane.xlu1 %909 }
 0xb60   :  { %v895_v35 = vpop.xlane.xlu0 %894  ;;  %vm911_vm5 = vcmp.eq.f32.partialorder %v908_v29, %v910_v33  ;;  %v916_v55 = vcvt.f32.s32 %v910_v33 }
 0xb61   :  { %v912_v38 = vsel %vm911_vm5, %v907_v34, inf  ;;  %vm896_vm6 = vcmp.eq.f32.partialorder %v893_v30, %v895_v35  ;;  %v901_v56 = vcvt.f32.s32 %v895_v35 }
 0xb62   :  { %913 = vmin.xlane.f32.xlu1 %v912_v38  ;;  %v897_v40 = vsel %vm896_vm6, %v892_v36, inf  ;;  %v917_v3 = vshll.u32 %v916_v55, 16 }
 0xb63   :  { %898 = vmin.xlane.f32.xlu0 %v897_v40  ;;  %v902_v58 = vshll.u32 %v901_v56, 16 }
 0xb66   :  { %263 = vadd.xlane.f32.xlu1 %v262_v42 }
 0xb67   :  { %260 = vadd.xlane.f32.xlu0 %v259_v44 }
 0xb6a   :  { %592 = vadd.xlane.f32.xlu1 %v591_v45 }
 0xb6b   :  { %589 = vadd.xlane.f32.xlu0 %v588_v8 }
 0xb6e   :  { %927 = vadd.xlane.f32.xlu1 %v926_v51 }
 0xb6f   :  { %924 = vadd.xlane.f32.xlu0 %v923_v62 }
 0xbef   :  { %v914_v57 = vpop.xlane.xlu1 %913 }
 0xbf0   :  { %v915_v4 = vcvt.f32.s32 %v914_v57  ;;  %v899_v5 = vpop.xlane.xlu0 %898 }
 0xbf1   :  { %v900_v59 = vcvt.f32.s32 %v899_v5 }
 0xbf2   :  { %v918_v9 = vadd.s32 %v917_v3, %v915_v4 }
 0xbf3   :  { %v903_v10 = vadd.s32 %v902_v58, %v900_v59  ;;  %v264_v46 = vpop.xlane.xlu1 %263 }
 0xbf4   :  { %vm932_vm1 = vcmp.eq.s32.totalorder %v1392_v19, %v918_v9  ;;  %v1021_v12 = vmul.u32 256, %v918_v9  ;;  %v261_v52 = vpop.xlane.xlu0 %260  ;;  %v266_v24 = vadd.f32 %v264_v46, %v1399_v23 }
 0xbf5   :  { %v1020_v16 = vmul.u32 256, %v903_v10  ;;  %vm931_vm8 = vcmp.eq.s32.totalorder %v1392_v19, %v903_v10  ;;  %v1151_v48 = vsel %vm932_vm1, 1.0, %v1304_v50 }
 0xbf6   :  { %v1023_v47 = vadd.s32 %v1021_v12, %v688_v11  ;;  %v1150_v17 = vsel %vm931_vm8, 1.0, %v1304_v50  ;;  %v265_v50 = vadd.f32 %v261_v52, %v1394_v20  ;;  %v585_v25 = vadd.f32 %v1458_v14, %v266_v24 }
 0xbf7   :  { %v1022_v22 = vadd.s32 %v1020_v16, %v687_v13  ;;  %1241 = vmatprep.mubr.msk.f32.mxu0 %vm214_vm3, %v1150_v17  ;;  %v593_v27 = vpop.xlane.xlu1 %592 }
 0xbf8   :  { %1028 = vst.msk [vmem:[%s1610_s6 + $0x8] sm:$0xff] %vm1026_vm7, %v1023_v47  ;;  %1242 = vmatmul.mubr.msk.f32.vlgmr.msra.gmra.mrb[10].mxu0 %vm214_vm3, %v1151_v48  ;;  %v584_v26 = vadd.f32 %v1461_v15, %v265_v50  ;;  %v590_v28 = vpop.xlane.xlu0 %589  ;;  %v595_v29 = vadd.f32 %v593_v27, %v585_v25  ;;  %vm1080_vm3 = vcmp.eq.s32.totalorder %v1392_v19, 0 }
 0xbf9   :  { %1027 = vst.msk [vmem:[%s1610_s6] sm:$0xff] %vm1026_vm7, %v1022_v22 }
 0xbfa   :  { %v594_v30 = vadd.f32 %v590_v28, %v584_v26  ;;  %v920_v31 = vadd.f32 %v1518_v18, %v595_v29 }
 0xbfb   :  { %v928_v32 = vpop.xlane.xlu1 %927 }
 0xbfc   :  { %v919_v33 = vadd.f32 %v1521_v21, %v594_v30  ;;  %v925_v35 = vpop.xlane.xlu0 %924  ;;  %v930_v15 = vadd.f32 %v928_v32, %v920_v31 }
 0xbfe   :  { %v929_v37 = vadd.f32 %v925_v35, %v919_v33 }
 0xc00   :  { %v1044_v39 = vsel %vm1026_vm7, %v929_v37, 0.0 }
 0xccb   :  { %v1243_v34 = vpop.f32.mrb[10].mxu0 }
 0xccc   :  { %v1019_v36 = vadd.f32 %v1243_v34, %v1500_v60  ;;  %v1009_v23 = vpop.f32.mrb[11].mxu0 }
 0xccd   :  { %v1018_v20 = vadd.f32 %v1009_v23, %v1503_v0 }
 0xcce   :  { %1025 = vst.msk [vmem:[%s1609_s5 + $0x8] sm:$0xff] %vm34_vm0, %v1019_v36  ;;  %v1057_v14 = vsub.f32 %v1019_v36, %v1357_v2  ;;  %v1045_v2 = vsel %vm1026_vm7, %v930_v15, 0.0 }
 0xccf   :  { %1024 = vst.msk [vmem:[%s1609_s5] sm:$0xff] %vm34_vm0, %v1018_v20  ;;  %v1056_v18 = vsub.f32 %v1018_v20, %v1352_v1  ;;  %v1046_v40 = vadd.f32 %v1045_v2, %v1044_v39 }
 0xcd0   :  { %v1059_v60 = vmul.f32 %v1057_v14, %v1057_v14 }
 0xcd1   :  { %v1058_v21 = vmul.f32 %v1056_v18, %v1056_v18 }
 0xcd2   :  { %v1063_v0 = vsel %vm34_vm0, %v1059_v60, 0.0 }
 0xcd3   :  { %1064 = vadd.xlane.f32.xlu1 %v1063_v0  ;;  %v1060_v38 = vsel %vm34_vm0, %v1058_v21, 0.0  ;;  %vm1081_vm0 = vcmp.eq.s32.totalorder %v1392_v19, 1 }
 0xcd4   :  { %1061 = vadd.xlane.f32.xlu0 %v1060_v38 }
 0xcd8   :  { %1047 = vadd.xlane.f32.xlu0 %v1046_v40 }
 0xd60   :  { %v1065_v41 = vpop.xlane.xlu1 %1064 }
 0xd61   :  { %v1069_v42 = vsel %vm1026_vm7, %v1065_v41, 0.0  ;;  %v1062_v43 = vpop.xlane.xlu0 %1061 }
 0xd62   :  { %v1068_v1 = vsel %vm1026_vm7, %v1062_v43, 0.0 }
 0xd63   :  { %v1070_v44 = vadd.f32 %v1069_v42, %v1068_v1 }
 0xd65   :  { %1071 = vadd.xlane.f32.xlu1 %v1070_v44  ;;  %v1048_v7 = vpop.xlane.xlu0 %1047 }
 0xd66   :  { %v1049_v45 = vrot.slane %v1048_v7, 4 }
 0xd68   :  { %v1050_v49 = vadd.f32 %v1049_v45, %v1048_v7 }
 0xd6a   :  { %v1051_v8 = vrot.slane %v1050_v49, 2 }
 0xd6c   :  { %v1052_v51 = vadd.f32 %v1051_v8, %v1050_v49 }
 0xd6e   :  { %v1053_v62 = vrot.slane %v1052_v51, 1 }
 0xd70   :  { %v1054_v63 = vadd.f32 %v1053_v62, %v1052_v51 }
 0xd72   :  { %1274 = vpush %v1054_v63 }
 0xda3   :  { %s1275_s5 = spop %1274 }
 0xda4   :  { %v1084_v5 = vstv %s1275_s5 }
 0xdf2   :  { %v1072_v53 = vpop.xlane.xlu1 %1071 }
 0xdf3   :  { %v1073_v54 = vrot.slane %v1072_v53, 4 }
 0xdf5   :  { %v1074_v55 = vadd.f32 %v1073_v54, %v1072_v53 }
 0xdf7   :  { %v1075_v56 = vrot.slane %v1074_v55, 2 }
 0xdf9   :  { %v1076_v57 = vadd.f32 %v1075_v56, %v1074_v55 }
 0xdfb   :  { %v1077_v61 = vrot.slane %v1076_v57, 1 }
 0xdfd   :  { %v1078_v3 = vadd.f32 %v1077_v61, %v1076_v57 }
 0xdff   :  { %1276 = vpush %v1078_v3 }
 0xe30   :  { %s1277_s21 = spop %1276 }
 0xe31   :  { %v1082_v4 = vstv %s1277_s21 }
 0xe32   :  { %v1083_v6 = vsel %vm1081_vm0, %v1082_v4, 0.0 }
 0xe33   :  { %v1085_v58 = vsel %vm1080_vm3, %v1084_v5, %v1083_v6 }
 0xe34   :  { %1086 = vst [vmem:[#allocation2] sm:$0x1] %v1085_v58 }
 0xe35   :  { %1291 = shalt.err (!%p1288_p4)
}
 0xe36   :  { %s1292_s26 = scalar_lea.hbm %s1611_s7, 16 }
 0xe37   :  { %p1293_p5 = scmp.ne.s32.totalorder %s1611_s7, %s1292_s26  ;;  %p1296_p6 = scmp.lt.u32.totalorder %s1292_s26, %s1611_s7 }
 0xe39   :  { %p1298_p7 = pnand %p1296_p6, %p1293_p5 }
 0xe3b   :  { %1301 = shalt.err (!%p1298_p7)
}
 0xe3c   :  { %1100 = dma.vmem_to_hbm [thread:$0]  %s1098_s20, 16, %s1611_s7, [#allocation3]  }
 0xe3d   :  { %1302 = dma.done.wait [#allocation3], 16  }
 0xe3e   :  { %1303 = vsyncadd [#allocation3], 4294967280 }
 0xe3f   :  { %1108 = vsyncpa [#allocation3], 1 }

</bundles_post_ra>
